<compile_context>
chip_gen: v6e
topology: v6e:2x2x1
jax: 0.10.0
libtpu: 0.0.40
codegen_flags: <defaults>
</compile_context>

<pallas_src>
import functools

import jax
import jax.numpy as jnp
from jax.experimental import pallas as pl
from jax.experimental.pallas import tpu as pltpu


def _cbconv2d_kernel(x_ref, p_ref, w_ref, b_ref, po_ref, o_ref, scr_ref, *,
                     H, W, KH, KW, Cin, Cin_p, threshold, with_relu, use_im2col):
    """One batch image per grid step.

    x_ref / p_ref : (1, Cin, H*W)      current / previous input (flattened spatial)
    w_ref         : im2col: (Cout, KH*KW*Cin_p) bf16   |  per-tap: (KH*KW, Cout, Cin) bf16
    b_ref         : (Cout, 1) f32
    po_ref        : (1, Cout, H*W)     previous output (aliased with o_ref in HBM)
    o_ref         : (1, Cout, H*W)     output
    scr_ref       : im2col: (KH*KW*Cin_p, H*W) bf16 gather scratch
                    per-tap: (Cout, H*W) f32 accumulator
    """
    S = H * W
    ph, pw = KH // 2, KW // 2

    x = x_ref[0]                                                   # (Cin, S)
    p = p_ref[0]                                                   # (Cin, S)

    # --- change detection (full precision; NaN from inf-inf treated as changed) ---
    diff = jnp.abs(x - p)
    chg_c = jnp.logical_or(diff > threshold, jnp.isnan(diff)).astype(jnp.float32)
    changed = jnp.max(chg_c, axis=0, keepdims=True)                # (1, S) in {0,1}
    tile_changed = jnp.max(changed) > 0.0

    @pl.when(tile_changed)
    def _recompute():
        # In-kernel tap-validity ids (replaces the shipped (KK,S) mask array).
        flat = jax.lax.broadcasted_iota(jnp.int32, (1, S), 1)      # output flat idx
        col = flat % W                                             # output column

        if use_im2col:
            xm = x.astype(scr_ref.dtype)                           # bf16 once
        else:
            scr_ref[...] = jnp.zeros_like(scr_ref)                 # f32 accumulator

        cm = jnp.zeros((1, S), jnp.float32)                        # dilated change map

        for kh in range(KH):
            for kw in range(KW):
                dy, dx = kh - ph, kw - pw
                d = dy * W + dx
                lo, hi = max(0, -d), min(S, S - d)                 # static flat range
                tap = kh * KW + kw

                # validity: flat range handles rows, column check handles dx wrap
                row_ok = jnp.logical_and(flat >= lo, flat < hi)
                if dx != 0:
                    col_ok = jnp.logical_and(col + dx >= 0, col + dx < W)
                    vmask = jnp.logical_and(row_ok, col_ok)
                else:
                    col_ok = None
                    vmask = row_ok

                # --- change-map dilation on the XLU (masked cyclic roll) ---
                rolled_c = changed if d == 0 else pltpu.roll(changed, shift=(-d) % S, axis=1)
                cm = jnp.maximum(cm, jnp.where(vmask, rolled_c, 0.0))

                if use_im2col:
                    # --- im2col gather: shifted masked slice store (aligned rows) ---
                    r0 = tap * Cin_p
                    src = xm[:, lo + d:hi + d]                     # (Cin, hi-lo)
                    if col_ok is not None:
                        src = jnp.where(col_ok[:, lo:hi], src, 0)
                    scr_ref[r0:r0 + Cin, lo:hi] = src.astype(scr_ref.dtype)
                    # Zero only what the matmul reads as zeros (no full memset):
                    if lo > 0:
                        scr_ref[r0:r0 + Cin_p, 0:lo] = jnp.zeros((Cin_p, lo), scr_ref.dtype)
                    if hi < S:
                        scr_ref[r0:r0 + Cin_p, hi:S] = jnp.zeros((Cin_p, S - hi), scr_ref.dtype)
                    if Cin_p > Cin:
                        scr_ref[r0 + Cin:r0 + Cin_p, lo:hi] = jnp.zeros(
                            (Cin_p - Cin, hi - lo), scr_ref.dtype)
                else:
                    # --- per-tap dot: masked rolled slice, f32 accumulation ---
                    rolled_x = x if d == 0 else pltpu.roll(x, shift=(-d) % S, axis=1)
                    src = jnp.where(vmask, rolled_x, 0.0).astype(w_ref.dtype)   # (Cin, S)
                    scr_ref[...] += jnp.dot(w_ref[tap], src,
                                            preferred_element_type=jnp.float32)

        if use_im2col:
            # conv2d as ONE fused MXU matmul: (Cout, K_p) @ (K_p, S)
            y = jnp.dot(w_ref[...], scr_ref[...],
                        preferred_element_type=jnp.float32)        # (Cout, S) f32
        else:
            y = scr_ref[...]                                       # (Cout, S) f32
        y = y + b_ref[...]
        if with_relu:
            y = jnp.maximum(y, 0.0)

        # Changed outputs get the fresh conv, unchanged keep prevOutput.
        o_ref[0] = jnp.where(cm > 0.0, y.astype(o_ref.dtype), po_ref[0])

    @pl.when(jnp.logical_not(tile_changed))
    def _passthrough():
        # Nothing changed in this image: no FLOPs, carry prevOutput through
        # (the pipeline-managed output block must still be filled).
        o_ref[0] = po_ref[0]


def cbconv2d_forward(x_nchw, prev_input_nchw, prev_output_nchw, weight, bias,
                     threshold, with_relu=False, matmul_dtype=jnp.bfloat16,
                     use_im2col=None):
    """Functional CBConv2d.forward (forward_normal).  Returns output in NCHW."""
    N, Cin, H, W = x_nchw.shape
    Cout, Cin_w, KH, KW = weight.shape
    assert Cin_w == Cin
    S = H * W
    KK = KH * KW

    if use_im2col is None:
        use_im2col = Cin < 64       # small Cin: fused im2col; large Cin: per-tap dots

    # Sublane-align each tap's channel block (only needed by the im2col layout).
    Cin_p = ((Cin + 7) // 8) * 8 if use_im2col else Cin
    K_p = KK * Cin_p

    # Free reshapes (row-major layout unchanged): NCHW -> (N, C, H*W).
    x = x_nchw.reshape(N, Cin, S)
    p = prev_input_nchw.reshape(N, Cin, S)
    po = prev_output_nchw.reshape(N, Cout, S)

    mm_itm = jnp.dtype(matmul_dtype).itemsize
    if use_im2col:
        # Weight (Cout, Cin, KH, KW) -> im2col layout (Cout, KH*KW*Cin_p), zero pad rows.
        wt = jnp.transpose(weight, (0, 2, 3, 1)).reshape(Cout, KK, Cin)
        if Cin_p > Cin:
            wt = jnp.pad(wt, ((0, 0), (0, 0), (0, Cin_p - Cin)))
        w_arg = wt.reshape(Cout, K_p).astype(matmul_dtype)
        w_spec = pl.BlockSpec((Cout, K_p), lambda n: (0, 0))
        scratch = pltpu.VMEM((K_p, S), matmul_dtype)
        scratch_bytes = K_p * S * mm_itm
    else:
        # Per-tap layout (KH*KW, Cout, Cin).
        w_arg = jnp.transpose(weight, (2, 3, 0, 1)).reshape(KK, Cout, Cin).astype(matmul_dtype)
        w_spec = pl.BlockSpec((KK, Cout, Cin), lambda n: (0, 0, 0))
        scratch = pltpu.VMEM((Cout, S), jnp.float32)
        scratch_bytes = Cout * S * 4

    b2 = bias.reshape(Cout, 1).astype(jnp.float32)

    # Scoped-VMEM budget sized to the blocks, capped at ~75% of physical VMEM
    # (≈48 MiB on v7x, ≈96 MiB on v5e/v6e).
    itm = x_nchw.dtype.itemsize
    otm = prev_output_nchw.dtype.itemsize
    block_bytes = (2 * 2 * Cin * S * itm                 # x, p (double-buffered)
                   + 2 * 2 * Cout * S * otm              # prevOutput in + output out
                   + 2 * (int(w_arg.size) * mm_itm + Cout * 4)
                   + scratch_bytes)
    try:
        phys_vmem = int(pltpu.get_tpu_info().vmem_capacity_bytes)
    except Exception:
        phys_vmem = 64 * 1024 * 1024                     # conservative (v7x per-TC)
    cap = (phys_vmem * 3) // 4
    vmem_limit = int(min(max(2 * block_bytes, 16 * 1024 * 1024), cap))

    kernel = functools.partial(
        _cbconv2d_kernel, H=H, W=W, KH=KH, KW=KW, Cin=Cin, Cin_p=Cin_p,
        threshold=float(threshold), with_relu=with_relu, use_im2col=use_im2col)

    out_flat = pl.pallas_call(
        kernel,
        out_shape=jax.ShapeDtypeStruct((N, Cout, S), prev_output_nchw.dtype),
        grid_spec=pltpu.PrefetchScalarGridSpec(
            num_scalar_prefetch=0,
            grid=(N,),
            in_specs=[
                pl.BlockSpec((1, Cin, S), lambda n: (n, 0, 0)),    # x
                pl.BlockSpec((1, Cin, S), lambda n: (n, 0, 0)),    # prevInput
                w_spec,                                            # weight (bf16)
                pl.BlockSpec((Cout, 1), lambda n: (0, 0)),         # bias (f32)
                pl.BlockSpec((1, Cout, S), lambda n: (n, 0, 0)),   # prevOutput
            ],
            out_specs=pl.BlockSpec((1, Cout, S), lambda n: (n, 0, 0)),
            scratch_shapes=[scratch],
        ),
        input_output_aliases={4: 0},                     # prevOutput -> output
        compiler_params=pltpu.CompilerParams(
            dimension_semantics=("parallel",),
            vmem_limit_bytes=vmem_limit),
    )(x, p, w_arg, b2, po)

    return out_flat.reshape(N, Cout, H, W)


def _conv2d_ref(x, w, b, cast_dtype=None):
    """Plain JAX reference: conv2d, stride 1, 'same' padding, NCHW.

    With cast_dtype=bf16 the operands are quantized like the kernel's MXU path,
    so the only remaining difference is f32 accumulation order (tiny)."""
    if cast_dtype is not None:
        x = x.astype(cast_dtype).astype(jnp.float32)
        w = w.astype(cast_dtype).astype(jnp.float32)
    kh, kw = w.shape[2], w.shape[3]
    out = jax.lax.conv_general_dilated(
        x, w, window_strides=(1, 1),
        padding=((kh // 2, kh // 2), (kw // 2, kw // 2)),
        dimension_numbers=("NCHW", "OIHW", "NCHW"))
    return out + b[None, :, None, None]


if __name__ == "__main__":
    mmdt = jnp.bfloat16

    # ---------------- Config A: small Cin -> fused im2col path ----------------
    N, Cin, Cout, H, W, KH, KW = 2, 4, 8, 16, 16, 3, 3
    threshold = 0.1

    key = jax.random.PRNGKey(0)
    k1, k2, k3, k4, k5, k6 = jax.random.split(key, 6)
    x = jax.random.normal(k1, (N, Cin, H, W), jnp.float32)
    weight = jax.random.normal(k2, (Cout, Cin, KH, KW), jnp.float32) * 0.1
    bias = jax.random.normal(k3, (Cout,), jnp.float32) * 0.1

    # Call 1: uninitialized module state (PyTorch fills 1e309 == +inf), so every
    # pixel is marked changed -> full dense conv2d result.
    prev_in = jnp.full((N, Cin, H, W), jnp.inf, jnp.float32)
    prev_out = jnp.full((N, Cout, H, W), jnp.inf, jnp.float32)
    out1 = jax.block_until_ready(
        cbconv2d_forward(x, prev_in, prev_out, weight, bias, threshold,
                         matmul_dtype=mmdt))
    ref1 = _conv2d_ref(x, weight, bias, cast_dtype=mmdt)
    assert jnp.allclose(out1, ref1, atol=1e-2, rtol=1e-2), "first-call conv mismatch"

    # Call 2: perturb one pixel of batch element 0 only.  Batch 0 recomputes its
    # 3x3 output neighborhood (rest keeps prevOutput); batch 1 takes the pl.when
    # skip path.  References are built BEFORE the call (prevOutput is aliased).
    x2 = x.at[0, :, 5, 7].add(1.0)
    ref2_full = _conv2d_ref(x2, weight, bias, cast_dtype=mmdt)
    chg = jnp.zeros((N, 1, H, W), bool).at[0, 0, 4:7, 6:9].set(True)
    ref2 = jnp.where(chg, ref2_full, out1)
    out2 = jax.block_until_ready(
        cbconv2d_forward(x2, x, out1, weight, bias, threshold, matmul_dtype=mmdt))
    assert jnp.allclose(out2, ref2, atol=1e-2, rtol=1e-2), "change-based update mismatch"

    # Call 3: nothing changed anywhere -> both images take the skip path and the
    # output equals prevOutput exactly.
    out2_copy = out2 + 0.0   # value snapshot taken before the aliased call
    out3 = jax.block_until_ready(
        cbconv2d_forward(x2, x2, out2, weight, bias, threshold, matmul_dtype=mmdt))
    assert jnp.allclose(out3, out2_copy, atol=0.0, rtol=0.0), "skip-path mismatch"

    # ---------------- Config B: large Cin -> per-tap accumulation path ----------------
    Nb, Cinb, Coutb, Hb, Wb = 1, 128, 32, 16, 16
    xb = jax.random.normal(k4, (Nb, Cinb, Hb, Wb), jnp.float32)
    wb = jax.random.normal(k5, (Coutb, Cinb, KH, KW), jnp.float32) * 0.05
    bb = jax.random.normal(k6, (Coutb,), jnp.float32) * 0.1
    prev_in_b = jnp.full((Nb, Cinb, Hb, Wb), jnp.inf, jnp.float32)
    prev_out_b = jnp.full((Nb, Coutb, Hb, Wb), jnp.inf, jnp.float32)
    outb = jax.block_until_ready(
        cbconv2d_forward(xb, prev_in_b, prev_out_b, wb, bb, threshold,
                         matmul_dtype=mmdt, use_im2col=False))
    refb = _conv2d_ref(xb, wb, bb, cast_dtype=mmdt)
    assert jnp.allclose(outb, refb, atol=1e-2, rtol=1e-2), "per-tap path conv mismatch"

    print("KERNEL_OK")
</pallas_src>

<mosaic_0001>
module attributes {stable_mosaic.version = 11 : i64} {
  func.func @_cbconv2d_kernel(%arg0: i32, %arg1: memref<1x4x256xf32, #tpu.memory_space<vmem>>, %arg2: memref<1x4x256xf32, #tpu.memory_space<vmem>>, %arg3: memref<8x72xbf16, #tpu.memory_space<vmem>>, %arg4: memref<8x1xf32, #tpu.memory_space<vmem>>, %arg5: memref<1x8x256xf32, #tpu.memory_space<vmem>>, %arg6: memref<1x8x256xf32, #tpu.memory_space<vmem>>, %arg7: memref<72x256xbf16, #tpu.memory_space<vmem>>) attributes {dimension_semantics = [#tpu.dimension_semantics<parallel>], iteration_bounds = array<i64: 2>, scalar_prefetch = 0 : i64, scratch_operands = 1 : i64, tpu.core_type = #tpu.core_type<tc>, window_params = [{transform_indices = @transform_0, window_bounds = array<i64: 1, 4, 256>}, {transform_indices = @transform_1, window_bounds = array<i64: 1, 4, 256>}, {pipeline_mode = #tpu.pipeline_mode<synchronous>, transform_indices = @transform_2, window_bounds = array<i64: 8, 72>}, {pipeline_mode = #tpu.pipeline_mode<synchronous>, transform_indices = @transform_3, window_bounds = array<i64: 8, 1>}, {transform_indices = @transform_4, window_bounds = array<i64: 1, 8, 256>}, {transform_indices = @transform_5, window_bounds = array<i64: 1, 8, 256>}]} {
    %c0 = arith.constant 0 : index
    %c0_0 = arith.constant 0 : index
    %c0_1 = arith.constant 0 : index
    %0 = vector.load %arg1[%c0, %c0_0, %c0_1] : memref<1x4x256xf32, #tpu.memory_space<vmem>>, vector<1x4x256xf32>
    %1 = vector.shape_cast %0 : vector<1x4x256xf32> to vector<4x256xf32>
    %c0_2 = arith.constant 0 : index
    %c0_3 = arith.constant 0 : index
    %c0_4 = arith.constant 0 : index
    %2 = vector.load %arg2[%c0_2, %c0_3, %c0_4] : memref<1x4x256xf32, #tpu.memory_space<vmem>>, vector<1x4x256xf32>
    %3 = vector.shape_cast %2 : vector<1x4x256xf32> to vector<4x256xf32>
    %4 = arith.subf %1, %3 : vector<4x256xf32>
    %5 = math.absf %4 : vector<4x256xf32>
    %cst = arith.constant 1.000000e-01 : f32
    %6 = vector.broadcast %cst : f32 to vector<4x256xf32>
    %7 = arith.cmpf ogt, %5, %6 : vector<4x256xf32>
    %8 = arith.cmpf one, %5, %5 : vector<4x256xf32>
    %9 = arith.ori %7, %8 : vector<4x256xi1>
    %10 = arith.extui %9 : vector<4x256xi1> to vector<4x256xi32>
    %11 = arith.sitofp %10 : vector<4x256xi32> to vector<4x256xf32>
    %cst_5 = arith.constant dense<0xFF800000> : vector<256xf32>
    %12 = vector.multi_reduction <maximumf>, %11, %cst_5 [0] : vector<4x256xf32> to vector<256xf32>
    %13 = vector.shape_cast %12 : vector<256xf32> to vector<1x256xf32>
    %14 = vector.shape_cast %13 : vector<1x256xf32> to vector<1x1x256xf32>
    %cst_6 = arith.constant dense<0xFF800000> : vector<1xf32>
    %15 = vector.multi_reduction <maximumf>, %14, %cst_6 [1, 2] : vector<1x1x256xf32> to vector<1xf32>
    %16 = vector.shape_cast %15 : vector<1xf32> to vector<1x1x1xf32>
    %17 = vector.extract %16[0, 0, 0] : f32 from vector<1x1x1xf32>
    %cst_7 = arith.constant 0.000000e+00 : f32
    %18 = arith.cmpf ogt, %17, %cst_7 : f32
    %19 = arith.extui %18 : i1 to i32
    %c0_i32 = arith.constant 0 : i32
    %20 = arith.cmpi ne, %19, %c0_i32 : i32
    scf.if %20 {
      %24 = tpu.iota {dimensions = array<i32: 1>} : vector<1x256xi32>
      %c16_i32 = arith.constant 16 : i32
      %c0_i32_9 = arith.constant 0 : i32
      %25 = arith.cmpi eq, %c16_i32, %c0_i32_9 : i32
      %c1_i32 = arith.constant 1 : i32
      %26 = arith.select %25, %c1_i32, %c16_i32 : i32
      %27 = vector.broadcast %26 : i32 to vector<1x256xi32>
      %28 = arith.remsi %24, %27 : vector<1x256xi32>
      %c0_i32_10 = arith.constant 0 : i32
      %29 = vector.broadcast %c0_i32_10 : i32 to vector<1x256xi32>
      %30 = arith.cmpi ne, %28, %29 : vector<1x256xi32>
      %c0_i32_11 = arith.constant 0 : i32
      %31 = vector.broadcast %c0_i32_11 : i32 to vector<1x256xi32>
      %32 = arith.cmpi slt, %28, %31 : vector<1x256xi32>
      %c0_i32_12 = arith.constant 0 : i32
      %33 = arith.cmpi slt, %26, %c0_i32_12 : i32
      %34 = vector.broadcast %33 : i1 to vector<1x256xi1>
      %35 = vector.broadcast %34 : vector<1x256xi1> to vector<1x256xi1>
      %36 = arith.xori %32, %35 : vector<1x256xi1>
      %37 = arith.andi %36, %30 : vector<1x256xi1>
      %38 = vector.broadcast %26 : i32 to vector<1x256xi32>
      %39 = arith.addi %28, %38 : vector<1x256xi32>
      %40 = arith.select %37, %39, %28 : vector<1x256xi1>, vector<1x256xi32>
      %41 = arith.truncf %1 : vector<4x256xf32> to vector<4x256xbf16>
      %cst_13 = arith.constant 0.000000e+00 : f32
      %42 = vector.broadcast %cst_13 : f32 to vector<1x256xf32>
      %c17_i32 = arith.constant 17 : i32
      %43 = vector.broadcast %c17_i32 : i32 to vector<1x256xi32>
      %44 = arith.cmpi sge, %24, %43 : vector<1x256xi32>
      %c256_i32 = arith.constant 256 : i32
      %45 = vector.broadcast %c256_i32 : i32 to vector<1x256xi32>
      %46 = arith.cmpi slt, %24, %45 : vector<1x256xi32>
      %47 = arith.andi %44, %46 : vector<1x256xi1>
      %c-1_i32 = arith.constant -1 : i32
      %48 = vector.broadcast %c-1_i32 : i32 to vector<1x256xi32>
      %49 = arith.addi %40, %48 : vector<1x256xi32>
      %c0_i32_14 = arith.constant 0 : i32
      %50 = vector.broadcast %c0_i32_14 : i32 to vector<1x256xi32>
      %51 = arith.cmpi sge, %49, %50 : vector<1x256xi32>
      %c-1_i32_15 = arith.constant -1 : i32
      %52 = vector.broadcast %c-1_i32_15 : i32 to vector<1x256xi32>
      %53 = arith.addi %40, %52 : vector<1x256xi32>
      %c16_i32_16 = arith.constant 16 : i32
      %54 = vector.broadcast %c16_i32_16 : i32 to vector<1x256xi32>
      %55 = arith.cmpi slt, %53, %54 : vector<1x256xi32>
      %56 = arith.andi %51, %55 : vector<1x256xi1>
      %57 = arith.andi %47, %56 : vector<1x256xi1>
      %c17_i32_17 = arith.constant 17 : i32
      %58 = tpu.dynamic_rotate %13 by %c17_i32_17 dim 1 : vector<1x256xf32>, i32 -> vector<1x256xf32>
      %cst_18 = arith.constant 0.000000e+00 : f32
      %59 = vector.broadcast %cst_18 : f32 to vector<1x256xf32>
      %60 = arith.select %57, %58, %59 : vector<1x256xi1>, vector<1x256xf32>
      %61 = arith.maximumf %42, %60 : vector<1x256xf32>
      %62 = vector.extract_strided_slice %41 {offsets = [0, 0], sizes = [4, 239], strides = [1, 1]} : vector<4x256xbf16> to vector<4x239xbf16>
      %63 = vector.extract_strided_slice %56 {offsets = [0, 17], sizes = [1, 239], strides = [1, 1]} : vector<1x256xi1> to vector<1x239xi1>
      %c0_i32_19 = arith.constant 0 : i32
      %64 = arith.sitofp %c0_i32_19 : i32 to bf16
      %65 = vector.shape_cast %63 : vector<1x239xi1> to vector<1x239xi1>
      %66 = vector.broadcast %65 : vector<1x239xi1> to vector<4x239xi1>
      %67 = vector.broadcast %64 : bf16 to vector<4x239xbf16>
      %68 = arith.select %66, %62, %67 : vector<4x239xi1>, vector<4x239xbf16>
      %c0_20 = arith.constant 0 : index
      %c17 = arith.constant 17 : index
      %69 = vector.load %arg7[%c0_20, %c17] : memref<72x256xbf16, #tpu.memory_space<vmem>>, vector<4x239xbf16>
      tpu.vector_store %arg7[%c0_20, %c17], %68 {strides = array<i32>} : memref<72x256xbf16, #tpu.memory_space<vmem>>, vector<4x239xbf16>,
      %cst_21 = arith.constant 0.000000e+00 : bf16
      %70 = vector.broadcast %cst_21 : bf16 to vector<8x17xbf16>
      %c0_22 = arith.constant 0 : index
      %c0_23 = arith.constant 0 : index
      %71 = vector.load %arg7[%c0_22, %c0_23] : memref<72x256xbf16, #tpu.memory_space<vmem>>, vector<8x17xbf16>
      tpu.vector_store %arg7[%c0_22, %c0_23], %70 {strides = array<i32>} : memref<72x256xbf16, #tpu.memory_space<vmem>>, vector<8x17xbf16>,
      %cst_24 = arith.constant 0.000000e+00 : bf16
      %72 = vector.broadcast %cst_24 : bf16 to vector<4x239xbf16>
      %c4 = arith.constant 4 : index
      %c17_25 = arith.constant 17 : index
      %73 = vector.load %arg7[%c4, %c17_25] : memref<72x256xbf16, #tpu.memory_space<vmem>>, vector<4x239xbf16>
      tpu.vector_store %arg7[%c4, %c17_25], %72 {strides = array<i32>} : memref<72x256xbf16, #tpu.memory_space<vmem>>, vector<4x239xbf16>,
      %c16_i32_26 = arith.constant 16 : i32
      %74 = vector.broadcast %c16_i32_26 : i32 to vector<1x256xi32>
      %75 = arith.cmpi sge, %24, %74 : vector<1x256xi32>
      %c256_i32_27 = arith.constant 256 : i32
      %76 = vector.broadcast %c256_i32_27 : i32 to vector<1x256xi32>
      %77 = arith.cmpi slt, %24, %76 : vector<1x256xi32>
      %78 = arith.andi %75, %77 : vector<1x256xi1>
      %c16_i32_28 = arith.constant 16 : i32
      %79 = tpu.dynamic_rotate %13 by %c16_i32_28 dim 1 : vector<1x256xf32>, i32 -> vector<1x256xf32>
      %cst_29 = arith.constant 0.000000e+00 : f32
      %80 = vector.broadcast %cst_29 : f32 to vector<1x256xf32>
      %81 = arith.select %78, %79, %80 : vector<1x256xi1>, vector<1x256xf32>
      %82 = arith.maximumf %61, %81 : vector<1x256xf32>
      %83 = vector.extract_strided_slice %41 {offsets = [0, 0], sizes = [4, 240], strides = [1, 1]} : vector<4x256xbf16> to vector<4x240xbf16>
      %c8 = arith.constant 8 : index
      %c16 = arith.constant 16 : index
      %84 = vector.load %arg7[%c8, %c16] : memref<72x256xbf16, #tpu.memory_space<vmem>>, vector<4x240xbf16>
      tpu.vector_store %arg7[%c8, %c16], %83 {strides = array<i32>} : memref<72x256xbf16, #tpu.memory_space<vmem>>, vector<4x240xbf16>,
      %cst_30 = arith.constant 0.000000e+00 : bf16
      %85 = vector.broadcast %cst_30 : bf16 to vector<8x16xbf16>
      %c8_31 = arith.constant 8 : index
      %c0_32 = arith.constant 0 : index
      %86 = vector.load %arg7[%c8_31, %c0_32] : memref<72x256xbf16, #tpu.memory_space<vmem>>, vector<8x16xbf16>
      tpu.vector_store %arg7[%c8_31, %c0_32], %85 {strides = array<i32>} : memref<72x256xbf16, #tpu.memory_space<vmem>>, vector<8x16xbf16>,
      %cst_33 = arith.constant 0.000000e+00 : bf16
      %87 = vector.broadcast %cst_33 : bf16 to vector<4x240xbf16>
      %c12 = arith.constant 12 : index
      %c16_34 = arith.constant 16 : index
      %88 = vector.load %arg7[%c12, %c16_34] : memref<72x256xbf16, #tpu.memory_space<vmem>>, vector<4x240xbf16>
      tpu.vector_store %arg7[%c12, %c16_34], %87 {strides = array<i32>} : memref<72x256xbf16, #tpu.memory_space<vmem>>, vector<4x240xbf16>,
      %c15_i32 = arith.constant 15 : i32
      %89 = vector.broadcast %c15_i32 : i32 to vector<1x256xi32>
      %90 = arith.cmpi sge, %24, %89 : vector<1x256xi32>
      %c256_i32_35 = arith.constant 256 : i32
      %91 = vector.broadcast %c256_i32_35 : i32 to vector<1x256xi32>
      %92 = arith.cmpi slt, %24, %91 : vector<1x256xi32>
      %93 = arith.andi %90, %92 : vector<1x256xi1>
      %c1_i32_36 = arith.constant 1 : i32
      %94 = vector.broadcast %c1_i32_36 : i32 to vector<1x256xi32>
      %95 = arith.addi %40, %94 : vector<1x256xi32>
      %c0_i32_37 = arith.constant 0 : i32
      %96 = vector.broadcast %c0_i32_37 : i32 to vector<1x256xi32>
      %97 = arith.cmpi sge, %95, %96 : vector<1x256xi32>
      %c1_i32_38 = arith.constant 1 : i32
      %98 = vector.broadcast %c1_i32_38 : i32 to vector<1x256xi32>
      %99 = arith.addi %40, %98 : vector<1x256xi32>
      %c16_i32_39 = arith.constant 16 : i32
      %100 = vector.broadcast %c16_i32_39 : i32 to vector<1x256xi32>
      %101 = arith.cmpi slt, %99, %100 : vector<1x256xi32>
      %102 = arith.andi %97, %101 : vector<1x256xi1>
      %103 = arith.andi %93, %102 : vector<1x256xi1>
      %c15_i32_40 = arith.constant 15 : i32
      %104 = tpu.dynamic_rotate %13 by %c15_i32_40 dim 1 : vector<1x256xf32>, i32 -> vector<1x256xf32>
      %cst_41 = arith.constant 0.000000e+00 : f32
      %105 = vector.broadcast %cst_41 : f32 to vector<1x256xf32>
      %106 = arith.select %103, %104, %105 : vector<1x256xi1>, vector<1x256xf32>
      %107 = arith.maximumf %82, %106 : vector<1x256xf32>
      %108 = vector.extract_strided_slice %41 {offsets = [0, 0], sizes = [4, 241], strides = [1, 1]} : vector<4x256xbf16> to vector<4x241xbf16>
      %109 = vector.extract_strided_slice %102 {offsets = [0, 15], sizes = [1, 241], strides = [1, 1]} : vector<1x256xi1> to vector<1x241xi1>
      %c0_i32_42 = arith.constant 0 : i32
      %110 = arith.sitofp %c0_i32_42 : i32 to bf16
      %111 = vector.shape_cast %109 : vector<1x241xi1> to vector<1x241xi1>
      %112 = vector.broadcast %111 : vector<1x241xi1> to vector<4x241xi1>
      %113 = vector.broadcast %110 : bf16 to vector<4x241xbf16>
      %114 = arith.select %112, %108, %113 : vector<4x241xi1>, vector<4x241xbf16>
      %c16_43 = arith.constant 16 : index
      %c15 = arith.constant 15 : index
      %115 = vector.load %arg7[%c16_43, %c15] : memref<72x256xbf16, #tpu.memory_space<vmem>>, vector<4x241xbf16>
      tpu.vector_store %arg7[%c16_43, %c15], %114 {strides = array<i32>} : memref<72x256xbf16, #tpu.memory_space<vmem>>, vector<4x241xbf16>,
      %cst_44 = arith.constant 0.000000e+00 : bf16
      %116 = vector.broadcast %cst_44 : bf16 to vector<8x15xbf16>
      %c16_45 = arith.constant 16 : index
      %c0_46 = arith.constant 0 : index
      %117 = vector.load %arg7[%c16_45, %c0_46] : memref<72x256xbf16, #tpu.memory_space<vmem>>, vector<8x15xbf16>
      tpu.vector_store %arg7[%c16_45, %c0_46], %116 {strides = array<i32>} : memref<72x256xbf16, #tpu.memory_space<vmem>>, vector<8x15xbf16>,
      %cst_47 = arith.constant 0.000000e+00 : bf16
      %118 = vector.broadcast %cst_47 : bf16 to vector<4x241xbf16>
      %c20 = arith.constant 20 : index
      %c15_48 = arith.constant 15 : index
      %119 = vector.load %arg7[%c20, %c15_48] : memref<72x256xbf16, #tpu.memory_space<vmem>>, vector<4x241xbf16>
      tpu.vector_store %arg7[%c20, %c15_48], %118 {strides = array<i32>} : memref<72x256xbf16, #tpu.memory_space<vmem>>, vector<4x241xbf16>,
      %c1_i32_49 = arith.constant 1 : i32
      %120 = vector.broadcast %c1_i32_49 : i32 to vector<1x256xi32>
      %121 = arith.cmpi sge, %24, %120 : vector<1x256xi32>
      %c256_i32_50 = arith.constant 256 : i32
      %122 = vector.broadcast %c256_i32_50 : i32 to vector<1x256xi32>
      %123 = arith.cmpi slt, %24, %122 : vector<1x256xi32>
      %124 = arith.andi %121, %123 : vector<1x256xi1>
      %c-1_i32_51 = arith.constant -1 : i32
      %125 = vector.broadcast %c-1_i32_51 : i32 to vector<1x256xi32>
      %126 = arith.addi %40, %125 : vector<1x256xi32>
      %c0_i32_52 = arith.constant 0 : i32
      %127 = vector.broadcast %c0_i32_52 : i32 to vector<1x256xi32>
      %128 = arith.cmpi sge, %126, %127 : vector<1x256xi32>
      %c-1_i32_53 = arith.constant -1 : i32
      %129 = vector.broadcast %c-1_i32_53 : i32 to vector<1x256xi32>
      %130 = arith.addi %40, %129 : vector<1x256xi32>
      %c16_i32_54 = arith.constant 16 : i32
      %131 = vector.broadcast %c16_i32_54 : i32 to vector<1x256xi32>
      %132 = arith.cmpi slt, %130, %131 : vector<1x256xi32>
      %133 = arith.andi %128, %132 : vector<1x256xi1>
      %134 = arith.andi %124, %133 : vector<1x256xi1>
      %c1_i32_55 = arith.constant 1 : i32
      %135 = tpu.dynamic_rotate %13 by %c1_i32_55 dim 1 : vector<1x256xf32>, i32 -> vector<1x256xf32>
      %cst_56 = arith.constant 0.000000e+00 : f32
      %136 = vector.broadcast %cst_56 : f32 to vector<1x256xf32>
      %137 = arith.select %134, %135, %136 : vector<1x256xi1>, vector<1x256xf32>
      %138 = arith.maximumf %107, %137 : vector<1x256xf32>
      %139 = vector.extract_strided_slice %41 {offsets = [0, 0], sizes = [4, 255], strides = [1, 1]} : vector<4x256xbf16> to vector<4x255xbf16>
      %140 = vector.extract_strided_slice %133 {offsets = [0, 1], sizes = [1, 255], strides = [1, 1]} : vector<1x256xi1> to vector<1x255xi1>
      %c0_i32_57 = arith.constant 0 : i32
      %141 = arith.sitofp %c0_i32_57 : i32 to bf16
      %142 = vector.shape_cast %140 : vector<1x255xi1> to vector<1x255xi1>
      %143 = vector.broadcast %142 : vector<1x255xi1> to vector<4x255xi1>
      %144 = vector.broadcast %141 : bf16 to vector<4x255xbf16>
      %145 = arith.select %143, %139, %144 : vector<4x255xi1>, vector<4x255xbf16>
      %c24 = arith.constant 24 : index
      %c1 = arith.constant 1 : index
      %146 = vector.load %arg7[%c24, %c1] : memref<72x256xbf16, #tpu.memory_space<vmem>>, vector<4x255xbf16>
      tpu.vector_store %arg7[%c24, %c1], %145 {strides = array<i32>} : memref<72x256xbf16, #tpu.memory_space<vmem>>, vector<4x255xbf16>,
      %cst_58 = arith.constant 0.000000e+00 : bf16
      %147 = vector.broadcast %cst_58 : bf16 to vector<8x1xbf16>
      %c24_59 = arith.constant 24 : index
      %c0_60 = arith.constant 0 : index
      %148 = vector.load %arg7[%c24_59, %c0_60] : memref<72x256xbf16, #tpu.memory_space<vmem>>, vector<8x1xbf16>
      tpu.vector_store %arg7[%c24_59, %c0_60], %147 {strides = array<i32>} : memref<72x256xbf16, #tpu.memory_space<vmem>>, vector<8x1xbf16>,
      %cst_61 = arith.constant 0.000000e+00 : bf16
      %149 = vector.broadcast %cst_61 : bf16 to vector<4x255xbf16>
      %c28 = arith.constant 28 : index
      %c1_62 = arith.constant 1 : index
      %150 = vector.load %arg7[%c28, %c1_62] : memref<72x256xbf16, #tpu.memory_space<vmem>>, vector<4x255xbf16>
      tpu.vector_store %arg7[%c28, %c1_62], %149 {strides = array<i32>} : memref<72x256xbf16, #tpu.memory_space<vmem>>, vector<4x255xbf16>,
      %c0_i32_63 = arith.constant 0 : i32
      %151 = vector.broadcast %c0_i32_63 : i32 to vector<1x256xi32>
      %152 = arith.cmpi sge, %24, %151 : vector<1x256xi32>
      %c256_i32_64 = arith.constant 256 : i32
      %153 = vector.broadcast %c256_i32_64 : i32 to vector<1x256xi32>
      %154 = arith.cmpi slt, %24, %153 : vector<1x256xi32>
      %155 = arith.andi %152, %154 : vector<1x256xi1>
      %cst_65 = arith.constant 0.000000e+00 : f32
      %156 = vector.broadcast %cst_65 : f32 to vector<1x256xf32>
      %157 = arith.select %155, %13, %156 : vector<1x256xi1>, vector<1x256xf32>
      %158 = arith.maximumf %138, %157 : vector<1x256xf32>
      %c32 = arith.constant 32 : index
      %c0_66 = arith.constant 0 : index
      %159 = vector.load %arg7[%c32, %c0_66] : memref<72x256xbf16, #tpu.memory_space<vmem>>, vector<4x256xbf16>
      tpu.vector_store %arg7[%c32, %c0_66], %41 {strides = array<i32>} : memref<72x256xbf16, #tpu.memory_space<vmem>>, vector<4x256xbf16>,
      %cst_67 = arith.constant 0.000000e+00 : bf16
      %160 = vector.broadcast %cst_67 : bf16 to vector<4x256xbf16>
      %c36 = arith.constant 36 : index
      %c0_68 = arith.constant 0 : index
      %161 = vector.load %arg7[%c36, %c0_68] : memref<72x256xbf16, #tpu.memory_space<vmem>>, vector<4x256xbf16>
      tpu.vector_store %arg7[%c36, %c0_68], %160 {strides = array<i32>} : memref<72x256xbf16, #tpu.memory_space<vmem>>, vector<4x256xbf16>,
      %c0_i32_69 = arith.constant 0 : i32
      %162 = vector.broadcast %c0_i32_69 : i32 to vector<1x256xi32>
      %163 = arith.cmpi sge, %24, %162 : vector<1x256xi32>
      %c255_i32 = arith.constant 255 : i32
      %164 = vector.broadcast %c255_i32 : i32 to vector<1x256xi32>
      %165 = arith.cmpi slt, %24, %164 : vector<1x256xi32>
      %166 = arith.andi %163, %165 : vector<1x256xi1>
      %c1_i32_70 = arith.constant 1 : i32
      %167 = vector.broadcast %c1_i32_70 : i32 to vector<1x256xi32>
      %168 = arith.addi %40, %167 : vector<1x256xi32>
      %c0_i32_71 = arith.constant 0 : i32
      %169 = vector.broadcast %c0_i32_71 : i32 to vector<1x256xi32>
      %170 = arith.cmpi sge, %168, %169 : vector<1x256xi32>
      %c1_i32_72 = arith.constant 1 : i32
      %171 = vector.broadcast %c1_i32_72 : i32 to vector<1x256xi32>
      %172 = arith.addi %40, %171 : vector<1x256xi32>
      %c16_i32_73 = arith.constant 16 : i32
      %173 = vector.broadcast %c16_i32_73 : i32 to vector<1x256xi32>
      %174 = arith.cmpi slt, %172, %173 : vector<1x256xi32>
      %175 = arith.andi %170, %174 : vector<1x256xi1>
      %176 = arith.andi %166, %175 : vector<1x256xi1>
      %c255_i32_74 = arith.constant 255 : i32
      %177 = tpu.dynamic_rotate %13 by %c255_i32_74 dim 1 : vector<1x256xf32>, i32 -> vector<1x256xf32>
      %cst_75 = arith.constant 0.000000e+00 : f32
      %178 = vector.broadcast %cst_75 : f32 to vector<1x256xf32>
      %179 = arith.select %176, %177, %178 : vector<1x256xi1>, vector<1x256xf32>
      %180 = arith.maximumf %158, %179 : vector<1x256xf32>
      %181 = vector.extract_strided_slice %41 {offsets = [0, 1], sizes = [4, 255], strides = [1, 1]} : vector<4x256xbf16> to vector<4x255xbf16>
      %182 = vector.extract_strided_slice %175 {offsets = [0, 0], sizes = [1, 255], strides = [1, 1]} : vector<1x256xi1> to vector<1x255xi1>
      %c0_i32_76 = arith.constant 0 : i32
      %183 = arith.sitofp %c0_i32_76 : i32 to bf16
      %184 = vector.shape_cast %182 : vector<1x255xi1> to vector<1x255xi1>
      %185 = vector.broadcast %184 : vector<1x255xi1> to vector<4x255xi1>
      %186 = vector.broadcast %183 : bf16 to vector<4x255xbf16>
      %187 = arith.select %185, %181, %186 : vector<4x255xi1>, vector<4x255xbf16>
      %c40 = arith.constant 40 : index
      %c0_77 = arith.constant 0 : index
      %188 = vector.load %arg7[%c40, %c0_77] : memref<72x256xbf16, #tpu.memory_space<vmem>>, vector<4x255xbf16>
      tpu.vector_store %arg7[%c40, %c0_77], %187 {strides = array<i32>} : memref<72x256xbf16, #tpu.memory_space<vmem>>, vector<4x255xbf16>,
      %cst_78 = arith.constant 0.000000e+00 : bf16
      %189 = vector.broadcast %cst_78 : bf16 to vector<8x1xbf16>
      %c40_79 = arith.constant 40 : index
      %c255 = arith.constant 255 : index
      %190 = vector.load %arg7[%c40_79, %c255] : memref<72x256xbf16, #tpu.memory_space<vmem>>, vector<8x1xbf16>
      tpu.vector_store %arg7[%c40_79, %c255], %189 {strides = array<i32>} : memref<72x256xbf16, #tpu.memory_space<vmem>>, vector<8x1xbf16>,
      %cst_80 = arith.constant 0.000000e+00 : bf16
      %191 = vector.broadcast %cst_80 : bf16 to vector<4x255xbf16>
      %c44 = arith.constant 44 : index
      %c0_81 = arith.constant 0 : index
      %192 = vector.load %arg7[%c44, %c0_81] : memref<72x256xbf16, #tpu.memory_space<vmem>>, vector<4x255xbf16>
      tpu.vector_store %arg7[%c44, %c0_81], %191 {strides = array<i32>} : memref<72x256xbf16, #tpu.memory_space<vmem>>, vector<4x255xbf16>,
      %c0_i32_82 = arith.constant 0 : i32
      %193 = vector.broadcast %c0_i32_82 : i32 to vector<1x256xi32>
      %194 = arith.cmpi sge, %24, %193 : vector<1x256xi32>
      %c241_i32 = arith.constant 241 : i32
      %195 = vector.broadcast %c241_i32 : i32 to vector<1x256xi32>
      %196 = arith.cmpi slt, %24, %195 : vector<1x256xi32>
      %197 = arith.andi %194, %196 : vector<1x256xi1>
      %c-1_i32_83 = arith.constant -1 : i32
      %198 = vector.broadcast %c-1_i32_83 : i32 to vector<1x256xi32>
      %199 = arith.addi %40, %198 : vector<1x256xi32>
      %c0_i32_84 = arith.constant 0 : i32
      %200 = vector.broadcast %c0_i32_84 : i32 to vector<1x256xi32>
      %201 = arith.cmpi sge, %199, %200 : vector<1x256xi32>
      %c-1_i32_85 = arith.constant -1 : i32
      %202 = vector.broadcast %c-1_i32_85 : i32 to vector<1x256xi32>
      %203 = arith.addi %40, %202 : vector<1x256xi32>
      %c16_i32_86 = arith.constant 16 : i32
      %204 = vector.broadcast %c16_i32_86 : i32 to vector<1x256xi32>
      %205 = arith.cmpi slt, %203, %204 : vector<1x256xi32>
      %206 = arith.andi %201, %205 : vector<1x256xi1>
      %207 = arith.andi %197, %206 : vector<1x256xi1>
      %c241_i32_87 = arith.constant 241 : i32
      %208 = tpu.dynamic_rotate %13 by %c241_i32_87 dim 1 : vector<1x256xf32>, i32 -> vector<1x256xf32>
      %cst_88 = arith.constant 0.000000e+00 : f32
      %209 = vector.broadcast %cst_88 : f32 to vector<1x256xf32>
      %210 = arith.select %207, %208, %209 : vector<1x256xi1>, vector<1x256xf32>
      %211 = arith.maximumf %180, %210 : vector<1x256xf32>
      %212 = vector.extract_strided_slice %41 {offsets = [0, 15], sizes = [4, 241], strides = [1, 1]} : vector<4x256xbf16> to vector<4x241xbf16>
      %213 = vector.extract_strided_slice %206 {offsets = [0, 0], sizes = [1, 241], strides = [1, 1]} : vector<1x256xi1> to vector<1x241xi1>
      %c0_i32_89 = arith.constant 0 : i32
      %214 = arith.sitofp %c0_i32_89 : i32 to bf16
      %215 = vector.shape_cast %213 : vector<1x241xi1> to vector<1x241xi1>
      %216 = vector.broadcast %215 : vector<1x241xi1> to vector<4x241xi1>
      %217 = vector.broadcast %214 : bf16 to vector<4x241xbf16>
      %218 = arith.select %216, %212, %217 : vector<4x241xi1>, vector<4x241xbf16>
      %c48 = arith.constant 48 : index
      %c0_90 = arith.constant 0 : index
      %219 = vector.load %arg7[%c48, %c0_90] : memref<72x256xbf16, #tpu.memory_space<vmem>>, vector<4x241xbf16>
      tpu.vector_store %arg7[%c48, %c0_90], %218 {strides = array<i32>} : memref<72x256xbf16, #tpu.memory_space<vmem>>, vector<4x241xbf16>,
      %cst_91 = arith.constant 0.000000e+00 : bf16
      %220 = vector.broadcast %cst_91 : bf16 to vector<8x15xbf16>
      %c48_92 = arith.constant 48 : index
      %c241 = arith.constant 241 : index
      %221 = vector.load %arg7[%c48_92, %c241] : memref<72x256xbf16, #tpu.memory_space<vmem>>, vector<8x15xbf16>
      tpu.vector_store %arg7[%c48_92, %c241], %220 {strides = array<i32>} : memref<72x256xbf16, #tpu.memory_space<vmem>>, vector<8x15xbf16>,
      %cst_93 = arith.constant 0.000000e+00 : bf16
      %222 = vector.broadcast %cst_93 : bf16 to vector<4x241xbf16>
      %c52 = arith.constant 52 : index
      %c0_94 = arith.constant 0 : index
      %223 = vector.load %arg7[%c52, %c0_94] : memref<72x256xbf16, #tpu.memory_space<vmem>>, vector<4x241xbf16>
      tpu.vector_store %arg7[%c52, %c0_94], %222 {strides = array<i32>} : memref<72x256xbf16, #tpu.memory_space<vmem>>, vector<4x241xbf16>,
      %c0_i32_95 = arith.constant 0 : i32
      %224 = vector.broadcast %c0_i32_95 : i32 to vector<1x256xi32>
      %225 = arith.cmpi sge, %24, %224 : vector<1x256xi32>
      %c240_i32 = arith.constant 240 : i32
      %226 = vector.broadcast %c240_i32 : i32 to vector<1x256xi32>
      %227 = arith.cmpi slt, %24, %226 : vector<1x256xi32>
      %228 = arith.andi %225, %227 : vector<1x256xi1>
      %c240_i32_96 = arith.constant 240 : i32
      %229 = tpu.dynamic_rotate %13 by %c240_i32_96 dim 1 : vector<1x256xf32>, i32 -> vector<1x256xf32>
      %cst_97 = arith.constant 0.000000e+00 : f32
      %230 = vector.broadcast %cst_97 : f32 to vector<1x256xf32>
      %231 = arith.select %228, %229, %230 : vector<1x256xi1>, vector<1x256xf32>
      %232 = arith.maximumf %211, %231 : vector<1x256xf32>
      %233 = vector.extract_strided_slice %41 {offsets = [0, 16], sizes = [4, 240], strides = [1, 1]} : vector<4x256xbf16> to vector<4x240xbf16>
      %c56 = arith.constant 56 : index
      %c0_98 = arith.constant 0 : index
      %234 = vector.load %arg7[%c56, %c0_98] : memref<72x256xbf16, #tpu.memory_space<vmem>>, vector<4x240xbf16>
      tpu.vector_store %arg7[%c56, %c0_98], %233 {strides = array<i32>} : memref<72x256xbf16, #tpu.memory_space<vmem>>, vector<4x240xbf16>,
      %cst_99 = arith.constant 0.000000e+00 : bf16
      %235 = vector.broadcast %cst_99 : bf16 to vector<8x16xbf16>
      %c56_100 = arith.constant 56 : index
      %c240 = arith.constant 240 : index
      %236 = vector.load %arg7[%c56_100, %c240] : memref<72x256xbf16, #tpu.memory_space<vmem>>, vector<8x16xbf16>
      tpu.vector_store %arg7[%c56_100, %c240], %235 {strides = array<i32>} : memref<72x256xbf16, #tpu.memory_space<vmem>>, vector<8x16xbf16>,
      %cst_101 = arith.constant 0.000000e+00 : bf16
      %237 = vector.broadcast %cst_101 : bf16 to vector<4x240xbf16>
      %c60 = arith.constant 60 : index
      %c0_102 = arith.constant 0 : index
      %238 = vector.load %arg7[%c60, %c0_102] : memref<72x256xbf16, #tpu.memory_space<vmem>>, vector<4x240xbf16>
      tpu.vector_store %arg7[%c60, %c0_102], %237 {strides = array<i32>} : memref<72x256xbf16, #tpu.memory_space<vmem>>, vector<4x240xbf16>,
      %c0_i32_103 = arith.constant 0 : i32
      %239 = vector.broadcast %c0_i32_103 : i32 to vector<1x256xi32>
      %240 = arith.cmpi sge, %24, %239 : vector<1x256xi32>
      %c239_i32 = arith.constant 239 : i32
      %241 = vector.broadcast %c239_i32 : i32 to vector<1x256xi32>
      %242 = arith.cmpi slt, %24, %241 : vector<1x256xi32>
      %243 = arith.andi %240, %242 : vector<1x256xi1>
      %c1_i32_104 = arith.constant 1 : i32
      %244 = vector.broadcast %c1_i32_104 : i32 to vector<1x256xi32>
      %245 = arith.addi %40, %244 : vector<1x256xi32>
      %c0_i32_105 = arith.constant 0 : i32
      %246 = vector.broadcast %c0_i32_105 : i32 to vector<1x256xi32>
      %247 = arith.cmpi sge, %245, %246 : vector<1x256xi32>
      %c1_i32_106 = arith.constant 1 : i32
      %248 = vector.broadcast %c1_i32_106 : i32 to vector<1x256xi32>
      %249 = arith.addi %40, %248 : vector<1x256xi32>
      %c16_i32_107 = arith.constant 16 : i32
      %250 = vector.broadcast %c16_i32_107 : i32 to vector<1x256xi32>
      %251 = arith.cmpi slt, %249, %250 : vector<1x256xi32>
      %252 = arith.andi %247, %251 : vector<1x256xi1>
      %253 = arith.andi %243, %252 : vector<1x256xi1>
      %c239_i32_108 = arith.constant 239 : i32
      %254 = tpu.dynamic_rotate %13 by %c239_i32_108 dim 1 : vector<1x256xf32>, i32 -> vector<1x256xf32>
      %cst_109 = arith.constant 0.000000e+00 : f32
      %255 = vector.broadcast %cst_109 : f32 to vector<1x256xf32>
      %256 = arith.select %253, %254, %255 : vector<1x256xi1>, vector<1x256xf32>
      %257 = arith.maximumf %232, %256 : vector<1x256xf32>
      %258 = vector.extract_strided_slice %41 {offsets = [0, 17], sizes = [4, 239], strides = [1, 1]} : vector<4x256xbf16> to vector<4x239xbf16>
      %259 = vector.extract_strided_slice %252 {offsets = [0, 0], sizes = [1, 239], strides = [1, 1]} : vector<1x256xi1> to vector<1x239xi1>
      %c0_i32_110 = arith.constant 0 : i32
      %260 = arith.sitofp %c0_i32_110 : i32 to bf16
      %261 = vector.shape_cast %259 : vector<1x239xi1> to vector<1x239xi1>
      %262 = vector.broadcast %261 : vector<1x239xi1> to vector<4x239xi1>
      %263 = vector.broadcast %260 : bf16 to vector<4x239xbf16>
      %264 = arith.select %262, %258, %263 : vector<4x239xi1>, vector<4x239xbf16>
      %c64 = arith.constant 64 : index
      %c0_111 = arith.constant 0 : index
      %265 = vector.load %arg7[%c64, %c0_111] : memref<72x256xbf16, #tpu.memory_space<vmem>>, vector<4x239xbf16>
      tpu.vector_store %arg7[%c64, %c0_111], %264 {strides = array<i32>} : memref<72x256xbf16, #tpu.memory_space<vmem>>, vector<4x239xbf16>,
      %cst_112 = arith.constant 0.000000e+00 : bf16
      %266 = vector.broadcast %cst_112 : bf16 to vector<8x17xbf16>
      %c64_113 = arith.constant 64 : index
      %c239 = arith.constant 239 : index
      %267 = vector.load %arg7[%c64_113, %c239] : memref<72x256xbf16, #tpu.memory_space<vmem>>, vector<8x17xbf16>
      tpu.vector_store %arg7[%c64_113, %c239], %266 {strides = array<i32>} : memref<72x256xbf16, #tpu.memory_space<vmem>>, vector<8x17xbf16>,
      %cst_114 = arith.constant 0.000000e+00 : bf16
      %268 = vector.broadcast %cst_114 : bf16 to vector<4x239xbf16>
      %c68 = arith.constant 68 : index
      %c0_115 = arith.constant 0 : index
      %269 = vector.load %arg7[%c68, %c0_115] : memref<72x256xbf16, #tpu.memory_space<vmem>>, vector<4x239xbf16>
      tpu.vector_store %arg7[%c68, %c0_115], %268 {strides = array<i32>} : memref<72x256xbf16, #tpu.memory_space<vmem>>, vector<4x239xbf16>,
      %c0_116 = arith.constant 0 : index
      %c0_117 = arith.constant 0 : index
      %270 = vector.load %arg3[%c0_116, %c0_117] : memref<8x72xbf16, #tpu.memory_space<vmem>>, vector<8x72xbf16>
      %c0_118 = arith.constant 0 : index
      %c0_119 = arith.constant 0 : index
      %271 = vector.load %arg7[%c0_118, %c0_119] : memref<72x256xbf16, #tpu.memory_space<vmem>>, vector<72x256xbf16>
      %cst_120 = arith.constant dense<0.000000e+00> : vector<8x256xf32>
      %272 = tpu.matmul %270, %271, %cst_120 {dimension_numbers = #tpu.dot_dimension_numbers<[1], [0], [0], [1], [0, 0, 1, 1], [], []>} : vector<8x72xbf16>, vector<72x256xbf16>, vector<8x256xf32> -> vector<8x256xf32>
      %c0_121 = arith.constant 0 : index
      %c0_122 = arith.constant 0 : index
      %273 = vector.load %arg4[%c0_121, %c0_122] : memref<8x1xf32, #tpu.memory_space<vmem>>, vector<8x1xf32>
      %274 = vector.broadcast %273 : vector<8x1xf32> to vector<8x256xf32>
      %275 = arith.addf %272, %274 : vector<8x256xf32>
      %cst_123 = arith.constant 0.000000e+00 : f32
      %276 = vector.broadcast %cst_123 : f32 to vector<1x256xf32>
      %277 = arith.cmpf ogt, %257, %276 : vector<1x256xf32>
      %c0_124 = arith.constant 0 : index
      %c0_125 = arith.constant 0 : index
      %c0_126 = arith.constant 0 : index
      %278 = vector.load %arg5[%c0_124, %c0_125, %c0_126] : memref<1x8x256xf32, #tpu.memory_space<vmem>>, vector<1x8x256xf32>
      %279 = vector.shape_cast %278 : vector<1x8x256xf32> to vector<8x256xf32>
      %280 = vector.shape_cast %277 : vector<1x256xi1> to vector<1x256xi1>
      %281 = vector.broadcast %280 : vector<1x256xi1> to vector<8x256xi1>
      %282 = arith.select %281, %275, %279 : vector<8x256xi1>, vector<8x256xf32>
      %c0_127 = arith.constant 0 : index
      %c0_128 = arith.constant 0 : index
      %c0_129 = arith.constant 0 : index
      %283 = vector.load %arg6[%c0_127, %c0_128, %c0_129] : memref<1x8x256xf32, #tpu.memory_space<vmem>>, vector<1x8x256xf32>
      %284 = vector.shape_cast %283 : vector<1x8x256xf32> to vector<8x256xf32>
      %285 = vector.shape_cast %282 : vector<8x256xf32> to vector<1x8x256xf32>
      tpu.vector_store %arg6[%c0_127, %c0_128, %c0_129], %285 {strides = array<i32>} : memref<1x8x256xf32, #tpu.memory_space<vmem>>, vector<1x8x256xf32>,
    } else {
    }
    %true = arith.constant true
    %21 = arith.xori %18, %true : i1
    %22 = arith.extui %21 : i1 to i32
    %c0_i32_8 = arith.constant 0 : i32
    %23 = arith.cmpi ne, %22, %c0_i32_8 : i32
    scf.if %23 {
      %c0_9 = arith.constant 0 : index
      %c0_10 = arith.constant 0 : index
      %c0_11 = arith.constant 0 : index
      %24 = vector.load %arg5[%c0_9, %c0_10, %c0_11] : memref<1x8x256xf32, #tpu.memory_space<vmem>>, vector<1x8x256xf32>
      %25 = vector.shape_cast %24 : vector<1x8x256xf32> to vector<8x256xf32>
      %c0_12 = arith.constant 0 : index
      %c0_13 = arith.constant 0 : index
      %c0_14 = arith.constant 0 : index
      %26 = vector.load %arg6[%c0_12, %c0_13, %c0_14] : memref<1x8x256xf32, #tpu.memory_space<vmem>>, vector<1x8x256xf32>
      %27 = vector.shape_cast %26 : vector<1x8x256xf32> to vector<8x256xf32>
      %28 = vector.shape_cast %25 : vector<8x256xf32> to vector<1x8x256xf32>
      tpu.vector_store %arg6[%c0_12, %c0_13, %c0_14], %28 {strides = array<i32>} : memref<1x8x256xf32, #tpu.memory_space<vmem>>, vector<1x8x256xf32>,
    } else {
    }
    return
  }
  func.func @transform_0(%arg0: i32) -> (i32, i32, i32) {
    %c0_i32 = arith.constant 0 : i32
    %c0_i32_0 = arith.constant 0 : i32
    %c0_i32_1 = arith.constant 0 : i32
    return %arg0, %c0_i32, %c0_i32_0 : i32, i32, i32
  }
  func.func @transform_1(%arg0: i32) -> (i32, i32, i32) {
    %c0_i32 = arith.constant 0 : i32
    %c0_i32_0 = arith.constant 0 : i32
    %c0_i32_1 = arith.constant 0 : i32
    return %arg0, %c0_i32, %c0_i32_0 : i32, i32, i32
  }
  func.func @transform_2(%arg0: i32) -> (i32, i32) {
    %c0_i32 = arith.constant 0 : i32
    %c0_i32_0 = arith.constant 0 : i32
    %c0_i32_1 = arith.constant 0 : i32
    return %c0_i32, %c0_i32_0 : i32, i32
  }
  func.func @transform_3(%arg0: i32) -> (i32, i32) {
    %c0_i32 = arith.constant 0 : i32
    %c0_i32_0 = arith.constant 0 : i32
    %c0_i32_1 = arith.constant 0 : i32
    return %c0_i32, %c0_i32_0 : i32, i32
  }
  func.func @transform_4(%arg0: i32) -> (i32, i32, i32) {
    %c0_i32 = arith.constant 0 : i32
    %c0_i32_0 = arith.constant 0 : i32
    %c0_i32_1 = arith.constant 0 : i32
    return %arg0, %c0_i32, %c0_i32_0 : i32, i32, i32
  }
  func.func @transform_5(%arg0: i32) -> (i32, i32, i32) {
    %c0_i32 = arith.constant 0 : i32
    %c0_i32_0 = arith.constant 0 : i32
    %c0_i32_1 = arith.constant 0 : i32
    return %arg0, %c0_i32, %c0_i32_0 : i32, i32, i32
  }
}

</mosaic_0001>

<bundles_post_ra>
// kernel: tpu_custom_call.1
= control target key start
LH: loop header
LB: loop body
LE: loop exit
PB: predicated region body
PF: predicated region fallthrough
CT: control target
= control target key end

     0   :  { %10 = vsyncpa [#allocation4], 0  ;;  %s1651_s0 = inlined_call_operand.vmem [shape: f32[2,4,256], index: 0, kind: input, shape index: {}]   ;;  %s1652_s1 = inlined_call_operand.vmem [shape: f32[2,4,256], index: 1, kind: input, shape index: {}]   ;;  %s1653_s2 = inlined_call_operand.vmem [shape: bf16[8,72], index: 2, kind: input, shape index: {}]   ;;  %s1654_s3 = inlined_call_operand.vmem [shape: f32[8,1], index: 3, kind: input, shape index: {}]   ;;  %s1655_s4 = inlined_call_operand.hbm [shape: f32[2,8,256], index: 4, kind: input, shape index: {}, may-alias: {4,5}]   ;;  %s1656_s5 = inlined_call_operand.hbm [shape: f32[2,8,256], index: 5, kind: output, shape index: {}, may-alias: {4,5}]  }
   0x1   :  { %12 = vsyncpa [#allocation4 + $0x1], 0 }
   0x2   :  { %13 = vsyncpa [#allocation5], 0 }
   0x3   :  { %15 = vsyncpa [#allocation5 + $0x1], 0  ;;  %s1244_s18 = smov 0   ;;  %s1246_s19 = smov 0  }
   0x4   :  { %s1248_s20 = smov 0   ;;  %s1250_s21 = smov 0  }
   0x5 LB: > { %s1265_s22 = sadd.s32 4294967295, %s1200_s21   ;;  %s993_s23 = sadd.s32 4294967294, %s1200_s21   ;;  %s1200_s21 = sphi %s1250_s21, %s1707_s21   ;;  %s1196_s20 = sphi %s1248_s20, %s1706_s20   ;;  %s1192_s19 = sphi %s1246_s19, %s1705_s19   ;;  %s1188_s18 = sphi %s1244_s18, %s1704_s18  }
   0x6   : > { %s1269_s24 = sadd.s32 1, %s1200_s21   ;;  %s122_s25 = sadd.s32 1, %s1196_s20 }
   0x7   : > { %s119_s26 = ssub.s32 %s1200_s21, %s1269_s24  ;;  %p129_p0 = scmp.ne.s32.totalorder %s1196_s20, %s1192_s19 }
   0x8   : > { %p120_p1 = scmp.eq.s32.totalorder %s119_s26, 0  ;;  %p130_p2 = scmp.eq.s32.totalorder %s1200_s21, 0 }
   0x9   : > { %p135_p3 = scmp.ne.s32.totalorder %s1192_s19, %s1188_s18  ;;  %p136_p4 = scmp.eq.s32.totalorder %s1265_s22, 0 }
   0xa   : > { %s1281_s27 = scalar_select %p120_p1, %s1196_s20, %s122_s25  }
   0xb   : > { %p1283_p5 = por %p130_p2, %p129_p0  ;;  %p1287_p6 = por %p136_p4, %p135_p3 }
   0xc   : > { %p159_p7 = scmp.eq.s32.totalorder %s1265_s22, 1  ;;  %p165_p8 = scmp.eq.s32.totalorder %s993_s23, 1 }
   0xd   : > { %s1669_s29 = scalar_select %p1287_p6, 1, 0 }
   0xe   : > { %p1050_p10 = scmp.lt.s32.totalorder %s1200_s21, 2  ;;  %p1294_p11 = por %p159_p7, %p129_p0 }
   0xf   : > { %p1298_p12 = por %p165_p8, %p135_p3  ;;  %s207_s7 = sand.u32 1, %s1196_s20  }
  0x10   : > { %s1670_s30 = scalar_select %p1294_p11, 1, 0 }
  0x11   : > { %s1671_s6 = scalar_select %p1298_p12, 1, 0 }
  0x12   : > { %s1031_s8 = sshll.u32 %s1200_s21, 8  ;;  %s996_s9 = sshll.u32 %s207_s7, 4 }
  0x13   : > { %s1307_s12 = scalar_lea.hbm %s1655_s4, %s1031_s8  ;;  %s211_s13 = scalar_lea.vmem [#allocation3], %s996_s9 }
  0x14   : > { %s219_s14 = sshll.u32 %s211_s13, 4  ;;  %p1311_p13 = pnand %p1050_p10, %p1283_p5  ;;  %s1315_s14 = int_to_ptr.vmem [resolvable:$true] %s219_s14 }
  0x15   : > { %s208_s16 = scalar_lea.sflag [#allocation4], %s207_s7  ;;  %s1108_s17 = scalar_lea.hbm %s1307_s12, 256 }
  0x16   : > { %p1109_p2 = scmp.ne.s32.totalorder %s1307_s12, %s1108_s17  ;;  %p1110_p3 = pneg %p1311_p13 }
  0x17   : > { %s1113_s26 = scalar_lea.hbm %s1655_s4, 512  ;;  %p1114_p5 = scmp.lt.s32.totalorder %s1307_s12, %s1655_s4 }
  0x18   : > { %p1111_p4 = pnand %p1110_p3, %p1109_p2  ;;  %p1115_p8 = scmp.lt.s32.totalorder %s1113_s26, %s1108_s17 }
  0x1a   : > { %p1112_p7 = pneg %p1111_p4  ;;  %p1116_p10 = por %p1115_p8, %p1114_p5 }
  0x1c   : > { %p1117_p9 = pnand %p1116_p10, %p1112_p7 }
  0x1e   : > { %1120 = shalt.err (!%p1117_p9)
}
  0x1f   : > { %s1121_s7 = scalar_lea.vmem %s1315_s14, 256  ;;  %s1202_s9 = smov [#allocation3]  }
  0x20   : > { %p1122_p0 = scmp.ne.s32.totalorder %s1315_s14, %s1121_s7  ;;  %s1126_s10 = sshll.u32 %s1202_s9, 4  ;;  %s1127_s10 = int_to_ptr.vmem [resolvable:$false] %s1126_s10 }
  0x21   : > { %s1128_s11 = scalar_lea.vmem %s1127_s10, 512  ;;  %p1129_p4 = scmp.lt.s32.totalorder %s1315_s14, %s1127_s10 }
  0x22   : > { %p1124_p1 = pnand %p1122_p0, %p1110_p3  ;;  %p1130_p12 = scmp.lt.s32.totalorder %s1128_s11, %s1121_s7 }
  0x24   : > { %p1125_p2 = pneg %p1124_p1  ;;  %p1131_p11 = por %p1130_p12, %p1129_p4 }
  0x26   : > { %p1132_p6 = pnand %p1131_p11, %p1125_p2 }
  0x28   : > { %1135 = shalt.err (!%p1132_p6)
}
  0x29   : > { %1045 = dma.hbm_to_vmem [thread:$0]  (!%p1311_p13), %s1307_s12, 256, %s1315_s14, %s208_s16  }
  0x2a   : > { %p1673_p9 = scmp.lt.s32.totalorder %s1200_s21, 3  ;;  %p1674_p7 = scmp.ge.s32.totalorder %s1200_s21, 1 }
  0x2c   : > { %p225_p0 = pnand %p1674_p7, %p1673_p9 }
  0x2d   : > { %s1342_s13 = sand.u32 (!%p225_p0), 1, %s1192_s19   ;;  %p1675_p6 = scmp.ne.s32.totalorder (!%p225_p0), %s1669_s29, 0 }
  0x2e   : > { %228 = sbr.rel (%p225_p0) target bundleno = 795 (0x31b), region = 40  ;;  %s1000_s17 = sshll.u32 (!%p225_p0), %s1342_s13, 4 }
  0x2f   : > { %s231_s23 = scalar_lea.sflag (!%p225_p0), [#allocation4], %s1342_s13  ;;  %s1348_s15 = scalar_lea.vmem (!%p225_p0), [#allocation3], %s1000_s17 }
  0x33   : > { %1179 = dma.done.wait (%p1675_p6), %s231_s23, 256  }
  0x34   : > { %1181 = vsyncadd (%p1675_p6), %s231_s23, 4294967040  ;;  %p271_p11 = scmp.lt.s32.totalorder %s1265_s22, 1  ;;  %vm1664_vm2 = vcmask 1043456   ;;  %v1203_v4 = vmov 0.0   ;;  %s1378_s9 = scalar_lea.vmem [#allocation6], %s1000_s17 }
  0x36   : > { %s272_s12 = scalar_select %p271_p11, %s1265_s22, 1 }
  0x38   : > { %s1032_s14 = sshll.u32 %s272_s12, 3 }
  0x39   : > { %s275_s26 = scalar_lea.vmem %s1651_s0, %s1032_s14  ;;  %s280_s7 = scalar_lea.vmem %s1652_s1, %s1032_s14 }
  0x3a   : > { %v1362_v0 = vld [vmem:[%s275_s26] sm:$0xff] }
  0x3b   : > { %v285_v1 = vld [vmem:[%s280_s7] sm:$0xff] }
  0x3c   : > { %v286_v2 = vsub.f32 %v1362_v0, %v285_v1 }
  0x3e   : > { %v287_v3 = vand.u32 2147483647, %v286_v2 }
  0x40   : > { %vm288_vm0 = vcmp.gt.f32.partialorder %v287_v3, 0.1  ;;  %vm289_vm1 = vcmp.ne.f32.partialorder %v287_v3, %v287_v3 }
  0x41   : > { %vm290_vm3 = vmor %vm288_vm0, %vm289_vm1 }
  0x42   : > { %v1006_v5 = vsel %vm290_vm3, 1.0, %v1203_v4 }
  0x43   : > { %v294_v6 = vcombine.high %v1006_v5, %v1006_v5  ;;  %v297_v7 = vsel %vm1664_vm2, %v1006_v5, -inf }
  0x44   : > { %v298_v8 = vrot.slane %v297_v7, 4 }
  0x45   : > { %v304_v9 = vsel %vm1664_vm2, %v294_v6, -inf }
  0x46   : > { %v299_v10 = vmax.f32 %v297_v7, %v298_v8  ;;  %v305_v11 = vrot.slane %v304_v9, 4 }
  0x48   : > { %v300_v12 = vrot.slane %v299_v10, 2  ;;  %v306_v13 = vmax.f32 %v304_v9, %v305_v11 }
  0x4a   : > { %v301_v14 = vmax.f32 %v299_v10, %v300_v12  ;;  %v307_v15 = vrot.slane %v306_v13, 2 }
  0x4c   : > { %v302_v16 = vrot.slane %v301_v14, 1  ;;  %v308_v17 = vmax.f32 %v306_v13, %v307_v15 }
  0x4e   : > { %v1367_v18 = vmax.f32 %v301_v14, %v302_v16  ;;  %v309_v19 = vrot.slane %v308_v17, 1 }
  0x50   : > { %v1369_v20 = vmax.f32 %v308_v17, %v309_v19 }
  0x52   : > { %v311_v21 = vmax.f32 %v1367_v18, %v1369_v20 }
  0x54   : > { %312 = vmax.xlane.f32.xlu0 %v311_v21 }
  0xdd   : > { %v313_v22 = vpop.xlane.xlu0 %312 }
  0xde   : > { %1036 = vpush %v313_v22 }
 0x10f   : > { %s1373_s29 = spop %1036 }
 0x110   : > { %p315_p12 = scmp.gt.f32.partialorder %s1373_s29, 0.0 }
 0x111   : > { %v319_v23 = vlaneseq (%p315_p12)  ;;  %v1204_v24 = vmov (%p315_p12), 0   ;;  %v347_v37 = vcombine.high (%p315_p12), %v1362_v0, %v1362_v0  ;;  %s1205_s10 = smov (%p315_p12), 17   ;;  %s1206_s11 = smov (%p315_p12), 15   ;;  %vm1663_vm10 = vcmask (%p315_p12), 138240   ;;  %v755_v19 = vld [vmem:[%s1654_s3] sm:$0xff] (%p315_p12) }
 0x112   : > { %318 = sbr.rel (!%p315_p12) target bundleno = 764 (0x2fc), region = 48  ;;  %581 = vst [vmem:[#allocation2 + $0x20] sm:$0xcc] (%p315_p12), %v1204_v24  ;;  %848 = vmatprep.mubr.bf16.mxu0 (%p315_p12), %v1204_v24  ;;  %1094 = vset.pattern.permute.xlu0 (%p315_p12), %v1204_v24  ;;  %s1207_s17 = smov (%p315_p12), 1   ;;  %v349_v46 = vpack.c.bf16 (%p315_p12), %v1362_v0, %v1362_v0  ;;  %vm1666_vm11 = vcmask (%p315_p12), 121856   ;;  %vm1665_vm0 = vcmask (%p315_p12), 7168  }
 0x113   : > { %v1385_v25 = vand.u32 (%p315_p12), 127, %v319_v23  ;;  %v385_v28 = vshrl.u32 (%p315_p12), %v319_v23, 7  ;;  %v1421_v41 = vpack.c.bf16 (%p315_p12), %v347_v37, %v1362_v0  ;;  %s1208_s23 = smov (%p315_p12), 113   ;;  %s1209_s12 = smov (%p315_p12), 127   ;;  %v350_v47 = vpack.c.bf16 (%p315_p12), %v347_v37, %v347_v37 }
 0x114   : > { %s1210_s14 = smov (%p315_p12), 111   ;;  %s1211_s16 = smov (%p315_p12), 112  }
 0x115   : > { %v1388_v26 = vadd.s32 (%p315_p12), 128, %v1385_v25  ;;  %v326_v27 = vand.u32 (%p315_p12), 15, %v1385_v25  ;;  %v1401_v34 = vsub.s32 (%p315_p12), 0, %v385_v28  ;;  %v390_v35 = vsub.s32 (%p315_p12), 4, %v385_v28  ;;  %580 = vst [vmem:[#allocation2 + $0x20] sm:$0x33] (%p315_p12), %v1421_v41 }
 0x116   : > { %s1212_s25 = smov (%p315_p12), 16  }
 0x117   : > { %v333_v29 = vand.u32 15, %v1388_v26  ;;  %v1392_v30 = vadd.s32 1, %v326_v27  ;;  %v1394_v31 = vadd.s32 4294967295, %v326_v27 }
 0x119   : > { %v1396_v32 = vadd.s32 1, %v333_v29  ;;  %vm1660_vm4 = vcmp.lt.s32.totalorder %v1392_v30, 16  ;;  %v1399_v33 = vadd.s32 4294967295, %v333_v29  ;;  %vm1662_vm5 = vcmp.ge.s32.totalorder %v1394_v31, 0 }
 0x11b   : > { %vm1659_vm6 = vcmp.lt.s32.totalorder %v1396_v32, 16  ;;  %vm1661_vm7 = vcmp.ge.s32.totalorder %v1399_v33, 0 }
 0x11c   : > { %vm486_vm8 = vmpackc.low %vm1659_vm6, %vm1660_vm4  ;;  %vm669_vm4 = vcmask 924678  }
 0x11d   : > { %v487_v36 = vsel %vm486_vm8, 65537, %v1204_v24  ;;  %vm382_vm9 = vmpackc.low %vm1661_vm7, %vm1662_vm5  ;;  %vm500_vm8 = vcmask 924672   ;;  %vm740_vm7 = vcmask 1044344  }
 0x11e   : > { %v491_v38 = vrot.slane %v487_v36, %v1401_v34  ;;  %v383_v39 = vsel %vm382_vm9, 65537, %v1204_v24  ;;  %v495_v42 = vrot.slane %v487_v36, %v390_v35 }
 0x11f   : > { %v387_v40 = vrot.slane %v383_v39, %v1401_v34  ;;  %v391_v43 = vrot.slane %v383_v39, %v390_v35 }
 0x120   : > { %718 = vrot.lane.b32.xlu0 %v491_v38, %s1205_s10 }
 0x121   : > { %645 = vrot.lane.b32.xlu1 %v387_v40, %s1206_s11 }
 0x124   : > { %720 = vrot.lane.b32.xlu0 %v495_v42, %s1205_s10 }
 0x125   : > { %647 = vrot.lane.b32.xlu1 %v391_v43, %s1206_s11 }
 0x128   : > { %599 = vrot.lane.b32.xlu0 %v491_v38, %s1207_s17 }
 0x129   : > { %601 = vrot.lane.b32.xlu1 %v495_v42, %s1207_s17 }
 0x12c   : > { %496 = vrot.lane.b32.xlu0 %v491_v38, %s1208_s23 }
 0x12d   : > { %498 = vrot.lane.b32.xlu1 %v495_v42, %s1208_s23 }
 0x130   : > { %542 = vrot.lane.b32.xlu0 %v387_v40, %s1209_s12 }
 0x131   : > { %544 = vrot.lane.b32.xlu1 %v391_v43, %s1209_s12 }
 0x134   : > { %392 = vrot.lane.b32.xlu0 %v387_v40, %s1210_s14 }
 0x135   : > { %394 = vrot.lane.b32.xlu1 %v391_v43, %s1210_s14 }
 0x192   : > { %v719_v44 = vpop.permute.xlu0 %718 }
 0x193   : > { %v646_v45 = vpop.permute.xlu1 %645  ;;  %vm723_vm12 = vcmp.ne.s16.totalorder %v719_v44, 0 }
 0x194   : > { %vm650_vm13 = vcmp.ne.s16.totalorder %v646_v45, 0  ;;  %v725_v52 = vsel %vm723_vm12, %v349_v46, 0 }
 0x195   : > { %v652_v54 = vsel %vm650_vm13, %v349_v46, 0  ;;  %vm1667_vm13 = vcmask 1039360  }
 0x196   : > { %v721_v48 = vpop.permute.xlu0 %720 }
 0x197   : > { %v722_v49 = vsel %vm1663_vm10, %v719_v44, %v721_v48  ;;  %v648_v50 = vpop.permute.xlu1 %647  ;;  %vm693_vm10 = vcmask 914436  }
 0x198   : > { %vm724_vm14 = vcmp.ne.s16.totalorder %v722_v49, 0  ;;  %v649_v51 = vsel %vm1666_vm11, %v646_v45, %v648_v50  ;;  %vm619_vm11 = vcmask 1037316  }
 0x199   : > { %v726_v53 = vsel %vm724_vm14, %v350_v47, 0  ;;  %vm651_vm15 = vcmp.ne.s16.totalorder %v649_v51, 0 }
 0x19a   : > { %v653_v55 = vsel %vm651_vm15, %v350_v47, 0  ;;  %v600_v56 = vpop.permute.xlu0 %599  ;;  %v1013_v57 = vcombine.low %v725_v52, %v726_v53 }
 0x19b   : > { %vm604_vm1 = vcmp.ne.s16.totalorder %v600_v56, 0  ;;  %v602_v58 = vpop.permute.xlu1 %601  ;;  %v1012_v59 = vcombine.low %v652_v54, %v653_v55 }
 0x19c   : > { %v606_v60 = vsel %vm604_vm1, %v349_v46, 0  ;;  %v603_v61 = vsel %vm1665_vm0, %v600_v56, %v602_v58  ;;  %732 = vrot.lane.b32.xlu0 %v1013_v57, %s1210_s14  ;;  %vm396_vm1 = vcmask 908288   ;;  %vm667_vm0 = vcmask 1044360  }
 0x19d   : > { %vm605_vm3 = vcmp.ne.s16.totalorder %v603_v61, 0  ;;  %659 = vrot.lane.b32.xlu1 %v1012_v59, %s1208_s23 }
 0x19e   : > { %v607_v62 = vsel %vm605_vm3, %v350_v47, 0  ;;  %v497_v63 = vpop.permute.xlu0 %496 }
 0x19f   : > { %v499_v0 = vpop.permute.xlu1 %498  ;;  %v1011_v1 = vcombine.low %v606_v60, %v607_v62 }
 0x1a0   : > { %v501_v2 = vsel %vm500_vm8, %v497_v63, %v499_v0  ;;  %vm503_vm9 = vcmp.ne.s16.totalorder %v499_v0, 0  ;;  %687 = vrot.lane.b32.xlu0 %v1421_v41, %s1211_s16 }
 0x1a1   : > { %vm502_vm12 = vcmp.ne.s16.totalorder %v501_v2, 0  ;;  %v505_v3 = vsel %vm503_vm9, %v350_v47, 0  ;;  %613 = vrot.lane.b32.xlu1 %v1011_v1, %s1209_s12 }
 0x1a2   : > { %v504_v4 = vsel %vm502_vm12, %v349_v46, 0  ;;  %v543_v5 = vpop.permute.xlu0 %542  ;;  %vm618_vm12 = vcmask 1041408  }
 0x1a3   : > { %v1009_v6 = vcombine.low %v504_v4, %v505_v3  ;;  %v545_v7 = vpop.permute.xlu1 %544 }
 0x1a4   : > { %v547_v8 = vsel %vm1667_vm13, %v543_v5, %v545_v7  ;;  %vm549_vm14 = vcmp.ne.s16.totalorder %v545_v7, 0  ;;  %vm698_vm13 = vcmask 916486   ;;  %v745_v5 = vld [vmem:[%s1653_s2] sm:$0xf] }
 0x1a5   : > { %vm548_vm15 = vcmp.ne.s16.totalorder %v547_v8, 0  ;;  %v551_v9 = vsel %vm549_vm14, %v350_v47, 0  ;;  %511 = vrot.lane.b32.xlu0 %v1009_v6, %s1206_s11  ;;  %vm737_vm14 = vcmask 906244  }
 0x1a6   : > { %v550_v10 = vsel %vm548_vm15, %v349_v46, 0  ;;  %v393_v11 = vpop.permute.xlu0 %392  ;;  %vm664_vm15 = vcmask 922628   ;;  %vm738_vm6 = vmor %vm737_vm14, %vm618_vm12 }
 0x1a7   : > { %v1010_v12 = vcombine.low %v550_v10, %v551_v9  ;;  %v395_v13 = vpop.permute.xlu1 %394  ;;  %vm665_vm5 = vmor %vm664_vm15, %vm618_vm12  ;;  %vm690_vm15 = vcmask 916480  }
 0x1a8   : > { %v397_v14 = vsel %vm396_vm1, %v393_v11, %v395_v13  ;;  %vm399_vm3 = vcmp.ne.s16.totalorder %v395_v13, 0 }
 0x1a9   : > { %vm398_vm9 = vcmp.ne.s16.totalorder %v397_v14, 0  ;;  %v401_v15 = vsel %vm399_vm3, %v350_v47, 0  ;;  %557 = vrot.lane.b32.xlu1 %v1010_v12, %s1207_s17  ;;  %vm624_vm3 = vcmask 1043458  }
 0x1aa   : > { %v400_v16 = vsel %vm398_vm9, %v349_v46, 0  ;;  %vm742_vm9 = vcmask 908294   ;;  %vm1495_vm14 = vmor %vm669_vm4, %vm624_vm3  ;;  %vm696_vm4 = vcmask 1044352  }
 0x1ab   : > { %v1007_v17 = vcombine.low %v400_v16, %v401_v15  ;;  %vm1489_vm2 = vmor %vm742_vm9, %vm624_vm3 }
 0x1ac   : > { %vm694_vm9 = vmor %vm693_vm10, %vm618_vm12  ;;  %vm414_vm10 = vcmask 1045508  }
 0x1ad   : > { %443 = vrot.lane.b32.xlu1 %v1421_v41, %s1212_s25  ;;  %407 = vrot.lane.b32.xlu0 %v1007_v17, %s1205_s10 }
 0x1b1   : > { %369 = vrot.lane.b32.xlu1 %v1369_v20, %s1205_s10  ;;  %367 = vrot.lane.b32.xlu0 %v1367_v18, %s1205_s10 }
 0x1b5   : > { %429 = vrot.lane.b32.xlu1 %v1369_v20, %s1212_s25  ;;  %427 = vrot.lane.b32.xlu0 %v1367_v18, %s1212_s25 }
 0x1b9   : > { %473 = vrot.lane.b32.xlu1 %v1369_v20, %s1206_s11  ;;  %471 = vrot.lane.b32.xlu0 %v1367_v18, %s1206_s11 }
 0x1bd   : > { %533 = vrot.lane.b32.xlu1 %v1369_v20, %s1207_s17  ;;  %531 = vrot.lane.b32.xlu0 %v1367_v18, %s1207_s17 }
 0x1c1   : > { %590 = vrot.lane.b32.xlu1 %v1369_v20, %s1209_s12  ;;  %588 = vrot.lane.b32.xlu0 %v1367_v18, %s1209_s12 }
 0x1c5   : > { %636 = vrot.lane.b32.xlu1 %v1369_v20, %s1208_s23  ;;  %634 = vrot.lane.b32.xlu0 %v1367_v18, %s1208_s23 }
 0x1c9   : > { %678 = vrot.lane.b32.xlu1 %v1369_v20, %s1211_s16  ;;  %676 = vrot.lane.b32.xlu0 %v1367_v18, %s1211_s16 }
 0x1cd   : > { %709 = vrot.lane.b32.xlu1 %v1369_v20, %s1210_s14  ;;  %707 = vrot.lane.b32.xlu0 %v1367_v18, %s1210_s14 }
 0x1d1   : > { %758 = vperm.xlu0 %1094, %v755_v19  }
 0x20e   : > { %v733_v21 = vpop.permute.xlu0 %732 }
 0x20f   : > { %v734_v22 = vrot.slane %v733_v21, 4  ;;  %v660_v23 = vpop.permute.xlu1 %659 }
 0x210   : > { %v661_v27 = vrot.slane %v660_v23, 4 }
 0x211   : > { %v735_v29 = vsel %vm396_vm1, %v733_v21, %v734_v22  ;;  %vm625_vm1 = vcmask 1039366  }
 0x212   : > { %739 = vst.msk [vmem:[#allocation2 + $0x40] sm:$0x33] %vm738_vm6, %v735_v29  ;;  %v662_v36 = vsel %vm500_vm8, %v660_v23, %v661_v27  ;;  %v688_v37 = vpop.permute.xlu0 %687  ;;  %vm620_vm6 = vmor %vm619_vm11, %vm618_vm12  ;;  %vm517_vm8 = vcmask 1041528   ;;  %vm420_vm11 = vcmask 1047558   ;;  %vm522_vm12 = vcmask 1043578  }
 0x213   : > { %741 = vst.msk [vmem:[#allocation2 + $0x44] sm:$0xf] %vm740_vm7, %v1204_v24  ;;  %v689_v38 = vrot.slane %v688_v37, 4  ;;  %v614_v39 = vpop.permute.xlu1 %613  ;;  %vm622_vm7 = vcmask 1044472  }
 0x214   : > { %666 = vst.msk [vmem:[#allocation2 + $0x30] sm:$0x33] %vm665_vm5, %v662_v36  ;;  %v615_v40 = vrot.slane %v614_v39, 4  ;;  %vm699_vm5 = vmor %vm698_vm13, %vm624_vm3 }
 0x215   : > { %744 = vst.msk [vmem:[#allocation2 + $0x40] sm:$0xcc] %vm1489_vm2, %v1204_v24  ;;  %v691_v41 = vsel %vm690_vm15, %v688_v37, %v689_v38  ;;  %vm626_vm2 = vmor %vm625_vm1, %vm624_vm3  ;;  %vm563_vm15 = vcmask 1041416   ;;  %vm568_vm1 = vcmask 1043466  }
 0x216   : > { %668 = vst.msk [vmem:[#allocation2 + $0x34] sm:$0xf] %vm667_vm0, %v1204_v24  ;;  %vm1680_vm0 = vcmask 1039360   ;;  %vm518_vm13 = vmor %vm414_vm10, %vm517_vm8 }
 0x217   : > { %671 = vst.msk [vmem:[#allocation2 + $0x30] sm:$0xcc] %vm1495_vm14, %v1204_v24  ;;  %v616_v42 = vsel %vm1680_vm0, %v614_v39, %v615_v40  ;;  %v512_v43 = vpop.permute.xlu0 %511  ;;  %vm520_vm14 = vcmask 117760   ;;  %vm523_vm3 = vmor %vm420_vm11, %vm522_vm12  ;;  %vm1685_vm0 = vcmask 1043456   ;;  %vm419_vm12 = vcmask 1043594  }
 0x218   : > { %695 = vst.msk [vmem:[#allocation2 + $0x38] sm:$0x33] %vm694_vm9, %v691_v41  ;;  %v513_v44 = vrot.slane %v512_v43, 4  ;;  %vm1681_vm9 = vcmask 121856   ;;  %vm1526_vm8 = vmor %vm420_vm11, %vm568_vm1  ;;  %vm417_vm1 = vcmask 134144  }
 0x219   : > { %697 = vst.msk [vmem:[#allocation2 + $0x3c] sm:$0xf] %vm696_vm4, %v1204_v24  ;;  %vm564_vm4 = vmor %vm414_vm10, %vm563_vm15  ;;  %vm446_vm15 = vcmask 130048  }
 0x21a   : > { %621 = vst.msk [vmem:[#allocation2 + $0x28] sm:$0x33] %vm620_vm6, %v616_v42  ;;  %v515_v45 = vsel %vm1681_vm9, %v513_v44, %v512_v43  ;;  %vm413_vm6 = vcmask 1041544  }
 0x21b   : > { %700 = vst.msk [vmem:[#allocation2 + $0x38] sm:$0xcc] %vm699_vm5, %v1204_v24  ;;  %v558_v46 = vpop.permute.xlu1 %557  ;;  %vm566_vm5 = vcmask 3072  }
 0x21c   : > { %623 = vst.msk [vmem:[#allocation2 + $0x2c] sm:$0xf] %vm622_vm7, %v1204_v24  ;;  %v754_v47 = vld [vmem:[#allocation2 + $0x40] sm:$0xff]  ;;  %v559_v48 = vrot.slane %v558_v46, 4  ;;  %vm449_vm7 = vcmask 1041536  }
 0x21d   : > { %627 = vst.msk [vmem:[#allocation2 + $0x28] sm:$0xcc] %vm626_vm2, %v1204_v24  ;;  %v1023_v49 = vcombine.high %v754_v47, %v754_v47  ;;  %v1022_v50 = vcombine.low %v754_v47, %v754_v47  ;;  %vm1684_vm2 = vcmask 7168   ;;  %vm450_vm9 = vmor %vm414_vm10, %vm449_vm7  ;;  %vm371_vm7 = vcmp.lt.s32.totalorder %v1385_v25, 17 }
 0x21e   : > { %519 = vst.msk [vmem:[#allocation2 + $0x10] sm:$0x33] %vm518_vm13, %v515_v45  ;;  %v561_v52 = vsel %vm1684_vm2, %v559_v48, %v558_v46  ;;  %vm1686_vm13 = vmmov %vm1685_vm0  ;;  %vm1689_vm2 = vcmask 138240  }
 0x21f   : > { %521 = vst.msk [vmem:[#allocation2 + $0x10] sm:$0xf] %vm520_vm14, %v1204_v24  ;;  %1024 = vmatprep.subr.msk.bf16.mxu0 %vm1685_vm0, %v1023_v49  ;;  %v811_v53 = vsel %vm1686_vm13, %v1022_v50, 0  ;;  %vm1534_vm14 = vmor %vm414_vm10, %vm413_vm6  ;;  %v408_v55 = vpop.permute.xlu0 %407  ;;  %v444_v56 = vpop.permute.xlu1 %443  ;;  %vm452_vm6 = vcmask 125952   ;;  %vm806_vm10 = vcmask 588800   ;;  %vm423_vm13 = vcmp.ge.s32.totalorder %v1385_v25, 16 }
 0x220   : > { %524 = vst.msk [vmem:[#allocation2 + $0x10] sm:$0xcc] %vm523_vm3, %v1204_v24  ;;  %vm454_vm3 = vcmask 1043586   ;;  %823 = vmatpush1.bf16.msra.mxu0 %v811_v53  ;;  %v409_v58 = vrot.slane %v408_v55, 4  ;;  %v445_v59 = vrot.slane %v444_v56, 4 }
 0x221   : > { %565 = vst.msk [vmem:[#allocation2 + $0x18] sm:$0x33] %vm564_vm4, %v561_v52  ;;  %vm421_vm4 = vmor %vm420_vm11, %vm419_vm12  ;;  %vm431_vm12 = vcmp.lt.s32.totalorder %v1385_v25, 16 }
 0x222   : > { %v1096_v57 = vld [vmem:[#allocation2 + $0x34] ss:$8 sps:$4 sm:$0xff]   ;;  %567 = vst.msk [vmem:[#allocation2 + $0x18] sm:$0xf] %vm566_vm5, %v1204_v24  ;;  %v1098_v60 = vld [vmem:[#allocation2 + $0x30] ss:$8 sps:$4 sm:$0xff]   ;;  %v411_v61 = vsel %vm1689_vm2, %v409_v58, %v408_v55  ;;  %vm455_vm5 = vmor %vm420_vm11, %vm454_vm3  ;;  %v447_v62 = vsel %vm446_vm15, %v445_v59, %v444_v56 }
 0x223   : > { %570 = vst.msk [vmem:[#allocation2 + $0x18] sm:$0xcc] %vm1526_vm8, %v1204_v24  ;;  %824 = vmatprep.subr.bf16.mxu0 %v1096_v57  ;;  %v368_v6 = vpop.permute.xlu0 %367  ;;  %v370_v7 = vpop.permute.xlu1 %369  ;;  %vm351_vm11 = vcmp.ge.s32.totalorder %v1385_v25, 17  ;;  %vm1690_vm8 = vcmp.ge.s32.totalorder %v1394_v31, 0  ;;  %vm457_vm15 = vcmp.ge.s32.totalorder %v1385_v25, 15  ;;  %vm475_vm3 = vcmp.lt.s32.totalorder %v1385_v25, 15 }
 0x224   : > { %v1099_v63 = vld [vmem:[#allocation2 + $0x24] ss:$8 sps:$4 sm:$0xff]   ;;  %416 = vst.msk [vmem:[#allocation2] sm:$0x33] %vm1534_vm14, %v411_v61  ;;  %825 = vmatpush1.bf16.msra.mxu0 %v1098_v60  ;;  %v1101_v0 = vld [vmem:[#allocation2 + $0x20] ss:$8 sps:$4 sm:$0xff]   ;;  %vm365_vm0 = vmand %vm351_vm11, %vm1690_vm8  ;;  %v373_v12 = vsel %vm371_vm7, %v370_v7, %v368_v6  ;;  %v372_v13 = vsel %vm371_vm7, %v368_v6, %v370_v7 }
 0x225   : > { %451 = vst.msk [vmem:[#allocation2 + $0x8] sm:$0x33] %vm450_vm9, %v447_v62  ;;  %826 = vmatprep.subr.bf16.mxu0 %v1099_v63  ;;  %v374_v14 = vsel %vm365_vm0, %v373_v12, 0.0  ;;  %vm1691_vm14 = vcmp.ge.s32.totalorder %v1399_v33, 0  ;;  %vm1692_vm9 = vcmp.lt.s32.totalorder %v1392_v30, 16  ;;  %vm1693_vm2 = vmmov %vm1690_vm8  ;;  %vm592_vm7 = vcmp.lt.s32.totalorder %v1385_v25, 127 }
 0x226   : > { %418 = vst.msk [vmem:[#allocation2] sm:$0xf] %vm417_vm1, %v1204_v24  ;;  %v375_v16 = vsel %vm1691_vm14, %v372_v13, 0.0  ;;  %v376_v21 = vmax.f32 %v374_v14, 0.0  ;;  %vm469_vm1 = vmand %vm457_vm15, %vm1692_vm9  ;;  %vm583_vm8 = vcmp.lt.s32.totalorder %v1388_v26, 255  ;;  %vm638_vm0 = vcmp.lt.s32.totalorder %v1385_v25, 113 }
 0x227   : > { %453 = vst.msk [vmem:[#allocation2 + $0x8] sm:$0xf] %vm452_vm6, %v1204_v24  ;;  %v428_v8 = vpop.permute.xlu0 %427  ;;  %v430_v9 = vpop.permute.xlu1 %429  ;;  %v377_v23 = vmax.f32 %v375_v16, 0.0  ;;  %vm535_vm6 = vcmp.lt.s32.totalorder %v1385_v25, 1  ;;  %vm1695_vm11 = vmmov %vm1691_vm14  ;;  %vm629_vm15 = vcmp.lt.s32.totalorder %v1388_v26, 241  ;;  %v859_v14 = vld [vmem:[%s1348_s15] sm:$0xff] }
 0x228   : > { %422 = vst.msk [vmem:[#allocation2] sm:$0xcc] %vm421_vm4, %v1204_v24  ;;  %827 = vmatpush1.bf16.msra.mxu0 %v1101_v0  ;;  %v433_v15 = vsel %vm431_vm12, %v430_v9, %v428_v8  ;;  %v432_v28 = vsel %vm431_vm12, %v428_v8, %v430_v9  ;;  %vm525_vm4 = vcmp.ge.s32.totalorder %v1385_v25, 1  ;;  %vm1697_vm14 = vmmov %vm1692_vm9 }
 0x229   : > { %456 = vst.msk [vmem:[#allocation2 + $0x8] sm:$0xcc] %vm455_vm5, %v1204_v24  ;;  %v434_v22 = vsel %vm423_vm13, %v433_v15, 0.0  ;;  %v437_v39 = vmax.f32 %v377_v23, %v432_v28  ;;  %vm529_vm5 = vmand %vm525_vm4, %vm1693_vm2  ;;  %vm680_vm4 = vcmp.lt.s32.totalorder %v1385_v25, 112 }
 0x22a   : > { %v1102_v1 = vld [vmem:[#allocation2 + $0x14] ss:$8 sps:$4 sm:$0xff]   ;;  %v1104_v2 = vld [vmem:[#allocation2 + $0x10] ss:$8 sps:$4 sm:$0xff]   ;;  %v436_v29 = vmax.f32 %v376_v21, %v434_v22 }
 0x22b   : > { %828 = vmatprep.subr.bf16.mxu0 %v1102_v1  ;;  %v472_v10 = vpop.permute.xlu0 %471  ;;  %v474_v11 = vpop.permute.xlu1 %473 }
 0x22c   : > { %829 = vmatpush1.bf16.msra.mxu0 %v1104_v2  ;;  %v477_v27 = vsel %vm475_vm3, %v474_v11, %v472_v10  ;;  %v476_v35 = vsel %vm475_vm3, %v472_v10, %v474_v11  ;;  %vm1698_vm3 = vmmov %vm1695_vm11 }
 0x22d   : > { %v478_v36 = vsel %vm469_vm1, %v477_v27, 0.0  ;;  %vm633_vm9 = vmand %vm629_vm15, %vm1698_vm3 }
 0x22e   : > { %v480_v42 = vmax.f32 %v436_v29, %v478_v36  ;;  %vm1699_vm1 = vmmov %vm1693_vm2  ;;  %vm673_vm2 = vcmp.lt.s32.totalorder %v1388_v26, 240 }
 0x22f   : > { %v532_v17 = vpop.permute.xlu0 %531  ;;  %v534_v19 = vpop.permute.xlu1 %533 }
 0x230   : > { %v1105_v3 = vld [vmem:[#allocation2 + $0x4] ss:$8 sps:$4 sm:$0xff]   ;;  %v1107_v4 = vld [vmem:[#allocation2] ss:$8 sps:$4 sm:$0xff]   ;;  %v537_v40 = vsel %vm535_vm6, %v534_v19, %v532_v17  ;;  %v536_v43 = vsel %vm535_vm6, %v532_v17, %v534_v19  ;;  %vm711_vm6 = vcmp.lt.s32.totalorder %v1385_v25, 111 }
 0x231   : > { %830 = vmatprep.subr.bf16.mxu0 %v1105_v3  ;;  %v538_v44 = vsel %vm529_vm5, %v537_v40, 0.0  ;;  %v539_v46 = vsel %vm1695_vm11, %v536_v43, 0.0  ;;  %vm702_vm5 = vcmp.lt.s32.totalorder %v1388_v26, 239  ;;  %v860_v17 = vld [vmem:[%s1348_s15 + $0x8] sm:$0xff] }
 0x232   : > { %831 = vmatpush1.bf16.msra.mxu0 %v1107_v4  ;;  %v540_v49 = vmax.f32 %v480_v42, %v538_v44 }
 0x233   : > { %v589_v37 = vpop.permute.xlu0 %588  ;;  %v591_v38 = vpop.permute.xlu1 %590 }
 0x234   : > { %v593_v51 = vsel %vm592_vm7, %v589_v37, %v591_v38  ;;  %v577_v52 = vmax.f32 %v540_v49, %v1367_v18  ;;  %v594_v53 = vsel %vm592_vm7, %v591_v38, %v589_v37  ;;  %vm1700_vm7 = vmmov %vm1697_vm14 }
 0x235   : > { %1025 = vmatmul.mubr.msk.bf16.vlgmr.msra.gmra.mxu0 %vm806_vm10, %v745_v5  ;;  %vm1694_vm10 = vcmp.lt.s32.totalorder %v1396_v32, 16  ;;  %v595_v54 = vsel %vm1697_vm14, %v593_v51, 0.0 }
 0x236   : > { %v479_v41 = vsel %vm1694_vm10, %v476_v35, 0.0  ;;  %vm1696_vm12 = vmmov %vm1694_vm10  ;;  %v597_v60 = vmax.f32 %v577_v52, %v595_v54 }
 0x237   : > { %v481_v45 = vmax.f32 %v437_v39, %v479_v41  ;;  %v635_v47 = vpop.permute.xlu0 %634  ;;  %v637_v48 = vpop.permute.xlu1 %636  ;;  %vm587_vm13 = vmand %vm583_vm8, %vm1696_vm12 }
 0x238   : > { %v639_v58 = vsel %vm638_vm0, %v635_v47, %v637_v48  ;;  %v596_v59 = vsel %vm587_vm13, %v594_v53, 0.0  ;;  %v640_v18 = vsel %vm638_vm0, %v637_v48, %v635_v47  ;;  %vm706_vm11 = vmand %vm702_vm5, %vm1694_vm10 }
 0x239   : > { %v541_v50 = vmax.f32 %v481_v45, %v539_v46  ;;  %v641_v61 = vsel %vm1699_vm1, %v639_v58, 0.0  ;;  %v642_v63 = vsel %vm633_vm9, %v640_v18, 0.0 }
 0x23a   : > { %v643_v2 = vmax.f32 %v597_v60, %v641_v61 }
 0x23b   : > { %v677_v55 = vpop.permute.xlu0 %676  ;;  %v679_v56 = vpop.permute.xlu1 %678  ;;  %v578_v57 = vmax.f32 %v541_v50, %v1369_v20 }
 0x23c   : > { %v682_v20 = vsel %vm680_vm4, %v679_v56, %v677_v55  ;;  %v681_v3 = vsel %vm680_vm4, %v677_v55, %v679_v56 }
 0x23d   : > { %v598_v62 = vmax.f32 %v578_v57, %v596_v59  ;;  %v684_v5 = vsel %vm673_vm2, %v682_v20, 0.0  ;;  %v685_v31 = vmax.f32 %v643_v2, %v681_v3 }
 0x23f   : > { %v708_v0 = vpop.permute.xlu0 %707  ;;  %v710_v1 = vpop.permute.xlu1 %709  ;;  %v644_v33 = vmax.f32 %v598_v62, %v642_v63 }
 0x240   : > { %v712_v4 = vsel %vm711_vm6, %v708_v0, %v710_v1  ;;  %v713_v6 = vsel %vm711_vm6, %v710_v1, %v708_v0 }
 0x241   : > { %v714_v25 = vsel %vm1700_vm7, %v712_v4, 0.0  ;;  %v686_v7 = vmax.f32 %v644_v33, %v684_v5  ;;  %v715_v8 = vsel %vm706_vm11, %v713_v6, 0.0 }
 0x242   : > { %v716_v9 = vmax.f32 %v685_v31, %v714_v25 }
 0x243   : > { %v717_v10 = vmax.f32 %v686_v7, %v715_v8 }
 0x244   : > { %vm857_vm8 = vcmp.gt.f32.partialorder %v716_v9, 0.0 }
 0x245   : > { %vm858_vm0 = vcmp.gt.f32.partialorder %v717_v10, 0.0  ;;  %v861_v26 = vsel %vm857_vm8, 1, %v1204_v24 }
 0x246   : > { %v862_v11 = vsel %vm858_vm0, 1, %v1204_v24  ;;  %v866_v32 = vrot.slane %v861_v26, %v1401_v34 }
 0x247   : > { %v870_v13 = vrot.slane %v862_v11, %v1401_v34 }
 0x248   : > { %vm871_vm12 = vcmp.eq.s32.totalorder %v866_v32, 1 }
 0x249   : > { %vm872_vm13 = vcmp.eq.s32.totalorder %v870_v13, 1 }
 0x24c   : > { %v759_v12 = vpop.permute.xlu0 %758 }
 0x2f5   : > { %v850_v30 = vpop.f32.mrf.mxu0 }
 0x2f6   : > { %v851_v15 = vadd.f32 %v850_v30, %v759_v12 }
 0x2f7   : > { %v852_v16 = vpop.f32.mrf.mxu0 }
 0x2f8   : > { %v873_v19 = vsel %vm871_vm12, %v851_v15, %v859_v14  ;;  %v853_v21 = vadd.f32 %v852_v16, %v759_v12 }
 0x2f9   : > { %875 = vst [vmem:[%s1378_s9] sm:$0xff] %v873_v19  ;;  %v854_v22 = vpop.f32.mrf.mxu0 }
 0x2fa   : > { %v874_v23 = vsel %vm872_vm13, %v853_v21, %v860_v17 }
 0x2fb   : > { %876 = vst [vmem:[%s1378_s9 + $0x8] sm:$0xff] %v874_v23  ;;  %v855_v24 = vpop.f32.mrf.mxu0 }
 0x2fc PF: > { %879 = sbr.rel (%p315_p12) target bundleno = 771 (0x303), region = 52 }
 0x301   : > { %v880_v34 = vld [vmem:[%s1348_s15] sm:$0xff]  ;;  %v881_v27 = vld [vmem:[%s1348_s15 + $0x8] sm:$0xff] }
 0x302   : > { %882 = vst [vmem:[%s1378_s9] sm:$0xff] %v880_v34  ;;  %883 = vst [vmem:[%s1378_s9 + $0x8] sm:$0xff] %v881_v27 }
 0x303 PF: > { %s1035_s10 = sshll.u32 %s1265_s22, 8  ;;  %s899_s29 = sshll.u32 %s1378_s9, 4  ;;  %s900_s29 = int_to_ptr.vmem [resolvable:$true] %s899_s29 }
 0x304   : > { %s897_s23 = scalar_lea.hbm %s1656_s5, %s1035_s10  ;;  %s885_s12 = scalar_lea.sflag [#allocation5], %s1342_s13 }
 0x305   : > { %s1136_s14 = scalar_lea.vmem %s900_s29, 256  ;;  %p1701_p1 = scmp.ne.s32.totalorder %s1670_s30, 0 }
 0x306   : > { %p1137_p13 = scmp.ne.s32.totalorder %s900_s29, %s1136_s14  ;;  %s1213_s15 = smov [#allocation6]  }
 0x307   : > { %s1140_s16 = sshll.u32 %s1213_s15, 4  ;;  %s1141_s16 = int_to_ptr.vmem [resolvable:$false] %s1140_s16 }
 0x308   : > { %p1138_p3 = pnand %p1137_p13, %p1701_p1  ;;  %s1142_s25 = scalar_lea.vmem %s1141_s16, 512 }
 0x309   : > { %p1143_p8 = scmp.lt.s32.totalorder %s900_s29, %s1141_s16  ;;  %p1144_p10 = scmp.lt.s32.totalorder %s1142_s25, %s1136_s14 }
 0x30a   : > { %p1139_p5 = pneg %p1138_p3 }
 0x30b   : > { %p1145_p2 = por %p1144_p10, %p1143_p8 }
 0x30d   : > { %p1146_p4 = pnand %p1145_p2, %p1139_p5 }
 0x30f   : > { %1149 = shalt.err (!%p1146_p4)
}
 0x310   : > { %s1150_s22 = scalar_lea.hbm %s897_s23, 256  ;;  %s1154_s26 = scalar_lea.hbm %s1656_s5, 512 }
 0x311   : > { %p1151_p9 = scmp.ne.s32.totalorder %s897_s23, %s1150_s22  ;;  %p1155_p6 = scmp.lt.s32.totalorder %s897_s23, %s1656_s5 }
 0x312   : > { %p1156_p11 = scmp.lt.s32.totalorder %s1154_s26, %s1150_s22 }
 0x313   : > { %p1152_p7 = pnand %p1151_p9, %p1701_p1 }
 0x314   : > { %p1157_p12 = por %p1156_p11, %p1155_p6 }
 0x315   : > { %p1153_p0 = pneg %p1152_p7 }
 0x317   : > { %p1158_p13 = pnand %p1157_p12, %p1153_p0 }
 0x319   : > { %1161 = shalt.err (!%p1158_p13)
}
 0x31a   : > { %1040 = dma.vmem_to_hbm [thread:$0]  (%p1701_p1), %s900_s29, 256, %s897_s23, %s885_s12  }
 0x31b PF: > { %s911_s7 = sand.u32 1, %s1188_s18   ;;  %p1702_p3 = scmp.ne.s32.totalorder %s1671_s6, 0 }
 0x31c   : > { %p1703_p5 = scmp.ge.s32.totalorder %s1200_s21, 2  ;;  %s912_s10 = scalar_lea.sflag [#allocation5], %s911_s7 }
 0x31e   : > { %p1047_p8 = pnand %p1703_p5, %p1702_p3 }
 0x320   : > { %p1048_p10 = pneg %p1047_p8 }
 0x322   : > { %1183 = dma.done.wait (%p1048_p10), %s912_s10, 256  }
 0x323   : > { %1185 = vsyncadd (%p1048_p10), %s912_s10, 4294967040  ;;  %p18_p2 = scmp.ge.s32.totalorder %s1269_s24, 4   ;;  %s1704_s18 = smov %s1192_s19 }
 0x324   : > { %s1705_s19 = smov %s1196_s20  ;;  %s1706_s20 = smov %s1281_s27 }
 0x325   : > { %s1707_s21 = smov %s1269_s24  ;;  %20 = sbr.rel (!%p18_p2) target bundleno = 5 (0x5), region = 99 }
 0x32a   :  { %917 = vsyncpa [#allocation4], 1 }
 0x32b   :  { %919 = vsyncpa [#allocation4 + $0x1], 1 }
 0x32c   :  { %920 = vsyncpa [#allocation5], 1 }
 0x32d   :  { %922 = vsyncpa [#allocation5 + $0x1], 1 }

</bundles_post_ra>
